<compile_context>
chip_gen: v5e
topology: v5e:2x2
jax: 0.10.0
libtpu: 0.0.40
codegen_flags: <defaults>
</compile_context>

<pallas_src>
import functools

import jax
import jax.numpy as jnp
from jax.experimental import pallas as pl
from jax.experimental.pallas import tpu as pltpu


def _hswish(x):
    return (jnp.clip(x + 3.0, 0.0, 6.0) * (1.0 / 6.0)) * x


def _myblock_kernel(x_ref, w1_ref, b1_ref, w2_ref, b2_ref, o_ref, *,
                    seq_len, compute_dtype):
    rows = x_ref.shape[0]                       # block_batch * seq_len
    prec = (jax.lax.Precision.HIGHEST if compute_dtype == jnp.float32
            else jax.lax.Precision.DEFAULT)

    # ---- 1x1 conv (BN scale folded into w1): one small-K f32 MXU matmul ----
    h = jnp.dot(x_ref[...], w1_ref[...],
                preferred_element_type=jnp.float32, precision=prec)
    h = _hswish(h + b1_ref[...])                # (rows, mid_p) f32 on the VPU

    # ---- per-row sample-boundary masks, shape (rows, 1) (cheap int work) ----
    pos = jax.lax.broadcasted_iota(jnp.int32, (rows, 1), 0)
    if seq_len & (seq_len - 1) == 0:            # power-of-two length: use AND
        pos = pos & (seq_len - 1)
    else:
        pos = pos % seq_len
    is_first = pos == 0                         # l == 0 within a sample
    is_last = pos == seq_len - 1                # l == L-1 within a sample

    # ---- k=3, s=1, p=1 conv: +/-1 row shifts via sublane roll (XLU) ----
    h_c = h.astype(compute_dtype)
    h_prev = pltpu.roll(h, shift=1, axis=0)             # row l <- h[l-1] (wraps)
    h_next = pltpu.roll(h, shift=rows - 1, axis=0)      # row l <- h[l+1] (wraps)
    h_prev = jnp.where(is_first, 0.0, h_prev).astype(compute_dtype)
    h_next = jnp.where(is_last, 0.0, h_next).astype(compute_dtype)

    # Three accumulating MXU dots (BN scale folded into w2), f32 accumulation.
    y = jnp.dot(h_prev, w2_ref[0], preferred_element_type=jnp.float32,
                precision=prec)
    y = y + jnp.dot(h_c, w2_ref[1], preferred_element_type=jnp.float32,
                    precision=prec)
    y = y + jnp.dot(h_next, w2_ref[2], preferred_element_type=jnp.float32,
                    precision=prec)

    # Folded BN bias + h_swish; Dropout(0.5) is identity in eval mode.
    o_ref[...] = _hswish(y + b2_ref[...])       # (rows, growth) store, no padding


def _pick_block_batch(N, L, target_rows, requested=None):
    """Whole-sample blocks: divisor of N with rows % 8 == 0 (or the full array)."""
    legal = [bb for bb in range(1, N + 1)
             if N % bb == 0 and ((bb * L) % 8 == 0 or bb == N)]
    if requested is not None:
        under = [bb for bb in legal if bb <= requested]
        return max(under) if under else min(legal)
    under = [bb for bb in legal if bb * L <= target_rows]
    return max(under) if under else min(legal)


def myblock_forward(x_nlc, w1, scale1, bias1, w2, scale2, bias2, *,
                    block_batch=None, target_rows=1024, use_bf16=True):
    """x_nlc: (N, L, Cin) f32.  w1: (Cin, mid).  w2: (3, mid, growth).
    scale/bias: folded inference BatchNorm params.  Returns (N, L, growth) f32."""
    N, L, Cin = x_nlc.shape
    mid = w1.shape[1]
    growth = w2.shape[2]

    LANE = 128
    mid_p = pl.cdiv(mid, LANE) * LANE
    compute_dtype = jnp.bfloat16 if use_bf16 else jnp.float32

    # Fold BN scales into conv weights (tiny, one-time). w1 kept in f32.
    w1p = jnp.zeros((Cin, mid_p), jnp.float32).at[:, :mid].set(
        w1 * scale1.reshape(1, mid))
    b1p = jnp.zeros((1, mid_p), jnp.float32).at[:, :mid].set(bias1.reshape(1, mid))

    w2p = jnp.zeros((3, mid_p, growth), jnp.float32).at[:, :mid, :].set(
        w2 * scale2.reshape(1, 1, growth)).astype(compute_dtype)
    b2p = bias2.reshape(1, growth).astype(jnp.float32)

    bb = _pick_block_batch(N, L, target_rows, block_batch)
    rows = bb * L
    grid = (N // bb,)

    x_flat = x_nlc.reshape(N * L, Cin)          # f32, no wrapper-side cast

    kernel = functools.partial(_myblock_kernel, seq_len=L,
                               compute_dtype=compute_dtype)
    out = pl.pallas_call(
        kernel,
        out_shape=jax.ShapeDtypeStruct((N * L, growth), jnp.float32),
        grid_spec=pltpu.PrefetchScalarGridSpec(
            num_scalar_prefetch=0,
            grid=grid,
            in_specs=[
                pl.BlockSpec((rows, Cin), lambda n: (n, 0)),          # x rows
                pl.BlockSpec((Cin, mid_p), lambda n: (0, 0)),         # w1 (f32)
                pl.BlockSpec((1, mid_p), lambda n: (0, 0)),           # bias1
                pl.BlockSpec((3, mid_p, growth), lambda n: (0, 0, 0)),  # w2 taps
                pl.BlockSpec((1, growth), lambda n: (0, 0)),          # bias2
            ],
            out_specs=pl.BlockSpec((rows, growth), lambda n: (n, 0)),
        ),
        compiler_params=pltpu.CompilerParams(
            dimension_semantics=("parallel",),
            vmem_limit_bytes=32 * 1024 * 1024),
    )(x_flat, w1p, b1p, w2p, b2p)

    return out.reshape(N, L, growth)


def _reference(x_nlc, w1, scale1, bias1, w2, scale2, bias2):
    """Pure-JAX reference (full f32), same semantics as the PyTorch module."""
    N, L, Cin = x_nlc.shape
    hp = jax.lax.Precision.HIGHEST
    h = jnp.einsum("nlc,cm->nlm", x_nlc, w1, precision=hp)
    h = _hswish(h * scale1 + bias1)
    hpad = jnp.pad(h, ((0, 0), (1, 1), (0, 0)))
    y = sum(jnp.einsum("nlm,mg->nlg", hpad[:, t:t + L, :], w2[t], precision=hp)
            for t in range(3))
    return _hswish(y * scale2 + bias2)


def _make_params(key, in_planes, growth):
    mid = growth // 4
    ks = jax.random.split(key, 10)
    # torch conv1 weight (mid, Cin, 1)    -> kernel layout (Cin, mid)
    w1 = jax.random.normal(ks[0], (in_planes, mid), jnp.float32) * 0.3
    # torch conv weight  (growth, mid, 3) -> kernel layout (3, mid, growth)
    w2 = jax.random.normal(ks[1], (3, mid, growth), jnp.float32) * 0.2
    eps = 1e-5

    def bn(kg, kb, km, kv, c):
        g = jax.random.normal(kg, (c,), jnp.float32) * 0.1 + 1.0
        b = jax.random.normal(kb, (c,), jnp.float32) * 0.1
        rm = jax.random.normal(km, (c,), jnp.float32) * 0.1
        rv = jax.random.uniform(kv, (c,), jnp.float32, minval=0.5, maxval=1.5)
        s = g / jnp.sqrt(rv + eps)
        return s.reshape(1, c), (b - rm * s).reshape(1, c)

    scale1, bias1 = bn(ks[2], ks[3], ks[4], ks[5], mid)
    scale2, bias2 = bn(ks[6], ks[7], ks[8], ks[9], growth)
    return w1, scale1, bias1, w2, scale2, bias2


if __name__ == "__main__":
    key = jax.random.PRNGKey(0)
    kx1, kp1, kx2, kp2 = jax.random.split(key, 4)

    # ---- Config A: in_planes=4, growth_rate=32 (mid=8), N=2, L=16 ----
    N, Cin, L, growth = 2, 4, 16, 32
    x_ncl = jax.random.normal(kx1, (N, Cin, L), jnp.float32)   # torch NCL layout
    x_nlc = jnp.transpose(x_ncl, (0, 2, 1))                    # kernel NLC layout
    params = _make_params(kp1, Cin, growth)
    ref = _reference(x_nlc, *params)

    # 1) f32 path, default block sizing.
    out = jax.block_until_ready(myblock_forward(x_nlc, *params, use_bf16=False))
    assert out.shape == (N, L, growth)
    assert jnp.allclose(out, ref, atol=1e-3, rtol=1e-3), "f32 default mismatch"

    # 2) f32 path, 1 sample per block -> multi-step grid + block-edge masks.
    out_b1 = jax.block_until_ready(
        myblock_forward(x_nlc, *params, use_bf16=False, block_batch=1))
    assert jnp.allclose(out_b1, ref, atol=1e-3, rtol=1e-3), "f32 bb=1 mismatch"

    # 3) default (bf16 MXU operands for the k=3 conv, f32 accumulation).
    out_bf = jax.block_until_ready(myblock_forward(x_nlc, *params))
    assert out_bf.shape == (N, L, growth)
    assert jnp.allclose(out_bf, ref, atol=1e-1, rtol=1e-2), "bf16 mismatch"

    # ---- Config B: non-power-of-two length, several pipelined grid steps ----
    N2, Cin2, L2, growth2 = 16, 8, 24, 32
    x2 = jax.random.normal(kx2, (N2, L2, Cin2), jnp.float32)
    params2 = _make_params(kp2, Cin2, growth2)
    ref2 = _reference(x2, *params2)
    out2 = jax.block_until_ready(
        myblock_forward(x2, *params2, use_bf16=False, target_rows=96))
    assert jnp.allclose(out2, ref2, atol=1e-3, rtol=1e-3), "f32 config B mismatch"

    print("KERNEL_OK")
</pallas_src>

<mosaic_0001>
module attributes {stable_mosaic.version = 11 : i64} {
  func.func @_myblock_kernel(%arg0: i32, %arg1: memref<32x4xf32, #tpu.memory_space<vmem>>, %arg2: memref<4x128xf32, #tpu.memory_space<vmem>>, %arg3: memref<1x128xf32, #tpu.memory_space<vmem>>, %arg4: memref<3x128x32xf32, #tpu.memory_space<vmem>>, %arg5: memref<1x32xf32, #tpu.memory_space<vmem>>, %arg6: memref<32x32xf32, #tpu.memory_space<vmem>>) attributes {dimension_semantics = [#tpu.dimension_semantics<parallel>], iteration_bounds = array<i64: 1>, scalar_prefetch = 0 : i64, scratch_operands = 0 : i64, tpu.core_type = #tpu.core_type<tc>, window_params = [{transform_indices = @transform_0, window_bounds = array<i64: 32, 4>}, {pipeline_mode = #tpu.pipeline_mode<synchronous>, transform_indices = @transform_1, window_bounds = array<i64: 4, 128>}, {pipeline_mode = #tpu.pipeline_mode<synchronous>, transform_indices = @transform_2, window_bounds = array<i64: 1, 128>}, {pipeline_mode = #tpu.pipeline_mode<synchronous>, transform_indices = @transform_3, window_bounds = array<i64: 3, 128, 32>}, {pipeline_mode = #tpu.pipeline_mode<synchronous>, transform_indices = @transform_4, window_bounds = array<i64: 1, 32>}, {transform_indices = @transform_5, window_bounds = array<i64: 32, 32>}]} {
    %c0 = arith.constant 0 : index
    %c0_0 = arith.constant 0 : index
    %0 = vector.load %arg1[%c0, %c0_0] : memref<32x4xf32, #tpu.memory_space<vmem>>, vector<32x4xf32>
    %c0_1 = arith.constant 0 : index
    %c0_2 = arith.constant 0 : index
    %1 = vector.load %arg2[%c0_1, %c0_2] : memref<4x128xf32, #tpu.memory_space<vmem>>, vector<4x128xf32>
    %cst = arith.constant dense<0.000000e+00> : vector<32x128xf32>
    %2 = tpu.matmul %0, %1, %cst {dimension_numbers = #tpu.dot_dimension_numbers<[1], [0], [0], [1], [0, 0, 1, 1], [], []>, precision = #tpu.contract_precision<fp32>} : vector<32x4xf32>, vector<4x128xf32>, vector<32x128xf32> -> vector<32x128xf32>
    %c0_3 = arith.constant 0 : index
    %c0_4 = arith.constant 0 : index
    %3 = vector.load %arg3[%c0_3, %c0_4] : memref<1x128xf32, #tpu.memory_space<vmem>>, vector<1x128xf32>
    %4 = vector.broadcast %3 : vector<1x128xf32> to vector<32x128xf32>
    %5 = arith.addf %2, %4 : vector<32x128xf32>
    %cst_5 = arith.constant 3.000000e+00 : f32
    %6 = vector.broadcast %cst_5 : f32 to vector<32x128xf32>
    %7 = arith.addf %5, %6 : vector<32x128xf32>
    %cst_6 = arith.constant 0.000000e+00 : f32
    %cst_7 = arith.constant 6.000000e+00 : f32
    %8 = vector.broadcast %cst_6 : f32 to vector<32x128xf32>
    %9 = arith.maximumf %8, %7 : vector<32x128xf32>
    %10 = vector.broadcast %cst_7 : f32 to vector<32x128xf32>
    %11 = arith.minimumf %10, %9 : vector<32x128xf32>
    %cst_8 = arith.constant 0.166666672 : f32
    %12 = vector.broadcast %cst_8 : f32 to vector<32x128xf32>
    %13 = arith.mulf %11, %12 : vector<32x128xf32>
    %14 = arith.mulf %13, %5 : vector<32x128xf32>
    %15 = tpu.iota {dimensions = array<i32: 0>} : vector<32x1xi32>
    %c15_i32 = arith.constant 15 : i32
    %16 = vector.broadcast %c15_i32 : i32 to vector<32x1xi32>
    %17 = arith.andi %15, %16 : vector<32x1xi32>
    %c0_i32 = arith.constant 0 : i32
    %18 = vector.broadcast %c0_i32 : i32 to vector<32x1xi32>
    %19 = arith.cmpi eq, %17, %18 : vector<32x1xi32>
    %c15_i32_9 = arith.constant 15 : i32
    %20 = vector.broadcast %c15_i32_9 : i32 to vector<32x1xi32>
    %21 = arith.cmpi eq, %17, %20 : vector<32x1xi32>
    %c1_i32 = arith.constant 1 : i32
    %22 = tpu.dynamic_rotate %14 by %c1_i32 dim 0 : vector<32x128xf32>, i32 -> vector<32x128xf32>
    %c31_i32 = arith.constant 31 : i32
    %23 = tpu.dynamic_rotate %14 by %c31_i32 dim 0 : vector<32x128xf32>, i32 -> vector<32x128xf32>
    %cst_10 = arith.constant 0.000000e+00 : f32
    %24 = vector.shape_cast %19 : vector<32x1xi1> to vector<32x1xi1>
    %25 = vector.broadcast %24 : vector<32x1xi1> to vector<32x128xi1>
    %26 = vector.broadcast %cst_10 : f32 to vector<32x128xf32>
    %27 = arith.select %25, %26, %22 : vector<32x128xi1>, vector<32x128xf32>
    %cst_11 = arith.constant 0.000000e+00 : f32
    %28 = vector.shape_cast %21 : vector<32x1xi1> to vector<32x1xi1>
    %29 = vector.broadcast %28 : vector<32x1xi1> to vector<32x128xi1>
    %30 = vector.broadcast %cst_11 : f32 to vector<32x128xf32>
    %31 = arith.select %29, %30, %23 : vector<32x128xi1>, vector<32x128xf32>
    %c0_12 = arith.constant 0 : index
    %c0_13 = arith.constant 0 : index
    %c0_14 = arith.constant 0 : index
    %32 = vector.load %arg4[%c0_12, %c0_13, %c0_14] : memref<3x128x32xf32, #tpu.memory_space<vmem>>, vector<1x128x32xf32>
    %33 = vector.shape_cast %32 : vector<1x128x32xf32> to vector<128x32xf32>
    %cst_15 = arith.constant dense<0.000000e+00> : vector<32x32xf32>
    %34 = tpu.matmul %27, %33, %cst_15 {dimension_numbers = #tpu.dot_dimension_numbers<[1], [0], [0], [1], [0, 0, 1, 1], [], []>, precision = #tpu.contract_precision<fp32>} : vector<32x128xf32>, vector<128x32xf32>, vector<32x32xf32> -> vector<32x32xf32>
    %c1 = arith.constant 1 : index
    %c0_16 = arith.constant 0 : index
    %c0_17 = arith.constant 0 : index
    %35 = vector.load %arg4[%c1, %c0_16, %c0_17] : memref<3x128x32xf32, #tpu.memory_space<vmem>>, vector<1x128x32xf32>
    %36 = vector.shape_cast %35 : vector<1x128x32xf32> to vector<128x32xf32>
    %cst_18 = arith.constant dense<0.000000e+00> : vector<32x32xf32>
    %37 = tpu.matmul %14, %36, %cst_18 {dimension_numbers = #tpu.dot_dimension_numbers<[1], [0], [0], [1], [0, 0, 1, 1], [], []>, precision = #tpu.contract_precision<fp32>} : vector<32x128xf32>, vector<128x32xf32>, vector<32x32xf32> -> vector<32x32xf32>
    %38 = arith.addf %34, %37 : vector<32x32xf32>
    %c2 = arith.constant 2 : index
    %c0_19 = arith.constant 0 : index
    %c0_20 = arith.constant 0 : index
    %39 = vector.load %arg4[%c2, %c0_19, %c0_20] : memref<3x128x32xf32, #tpu.memory_space<vmem>>, vector<1x128x32xf32>
    %40 = vector.shape_cast %39 : vector<1x128x32xf32> to vector<128x32xf32>
    %cst_21 = arith.constant dense<0.000000e+00> : vector<32x32xf32>
    %41 = tpu.matmul %31, %40, %cst_21 {dimension_numbers = #tpu.dot_dimension_numbers<[1], [0], [0], [1], [0, 0, 1, 1], [], []>, precision = #tpu.contract_precision<fp32>} : vector<32x128xf32>, vector<128x32xf32>, vector<32x32xf32> -> vector<32x32xf32>
    %42 = arith.addf %38, %41 : vector<32x32xf32>
    %c0_22 = arith.constant 0 : index
    %c0_23 = arith.constant 0 : index
    %43 = vector.load %arg5[%c0_22, %c0_23] : memref<1x32xf32, #tpu.memory_space<vmem>>, vector<1x32xf32>
    %44 = vector.broadcast %43 : vector<1x32xf32> to vector<32x32xf32>
    %45 = arith.addf %42, %44 : vector<32x32xf32>
    %cst_24 = arith.constant 3.000000e+00 : f32
    %46 = vector.broadcast %cst_24 : f32 to vector<32x32xf32>
    %47 = arith.addf %45, %46 : vector<32x32xf32>
    %cst_25 = arith.constant 0.000000e+00 : f32
    %cst_26 = arith.constant 6.000000e+00 : f32
    %48 = vector.broadcast %cst_25 : f32 to vector<32x32xf32>
    %49 = arith.maximumf %48, %47 : vector<32x32xf32>
    %50 = vector.broadcast %cst_26 : f32 to vector<32x32xf32>
    %51 = arith.minimumf %50, %49 : vector<32x32xf32>
    %cst_27 = arith.constant 0.166666672 : f32
    %52 = vector.broadcast %cst_27 : f32 to vector<32x32xf32>
    %53 = arith.mulf %51, %52 : vector<32x32xf32>
    %54 = arith.mulf %53, %45 : vector<32x32xf32>
    %c0_28 = arith.constant 0 : index
    %c0_29 = arith.constant 0 : index
    %55 = vector.load %arg6[%c0_28, %c0_29] : memref<32x32xf32, #tpu.memory_space<vmem>>, vector<32x32xf32>
    tpu.vector_store %arg6[%c0_28, %c0_29], %54 {strides = array<i32>} : memref<32x32xf32, #tpu.memory_space<vmem>>, vector<32x32xf32>,
    return
  }
  func.func @transform_0(%arg0: i32) -> (i32, i32) {
    %c0_i32 = arith.constant 0 : i32
    %c0_i32_0 = arith.constant 0 : i32
    return %arg0, %c0_i32 : i32, i32
  }
  func.func @transform_1(%arg0: i32) -> (i32, i32) {
    %c0_i32 = arith.constant 0 : i32
    %c0_i32_0 = arith.constant 0 : i32
    %c0_i32_1 = arith.constant 0 : i32
    return %c0_i32, %c0_i32_0 : i32, i32
  }
  func.func @transform_2(%arg0: i32) -> (i32, i32) {
    %c0_i32 = arith.constant 0 : i32
    %c0_i32_0 = arith.constant 0 : i32
    %c0_i32_1 = arith.constant 0 : i32
    return %c0_i32, %c0_i32_0 : i32, i32
  }
  func.func @transform_3(%arg0: i32) -> (i32, i32, i32) {
    %c0_i32 = arith.constant 0 : i32
    %c0_i32_0 = arith.constant 0 : i32
    %c0_i32_1 = arith.constant 0 : i32
    %c0_i32_2 = arith.constant 0 : i32
    return %c0_i32, %c0_i32_0, %c0_i32_1 : i32, i32, i32
  }
  func.func @transform_4(%arg0: i32) -> (i32, i32) {
    %c0_i32 = arith.constant 0 : i32
    %c0_i32_0 = arith.constant 0 : i32
    %c0_i32_1 = arith.constant 0 : i32
    return %c0_i32, %c0_i32_0 : i32, i32
  }
  func.func @transform_5(%arg0: i32) -> (i32, i32) {
    %c0_i32 = arith.constant 0 : i32
    %c0_i32_0 = arith.constant 0 : i32
    return %arg0, %c0_i32 : i32, i32
  }
}

</mosaic_0001>

<bundles_post_ra>
// kernel: tpu_custom_call.1
= control target key start
LH: loop header
LB: loop body
LE: loop exit
PB: predicated region body
PF: predicated region fallthrough
CT: control target
= control target key end

     0   :  { %vm43_vm0 = vcmask 1043456   ;;  %vm30_vm1 = vcmask 31744   ;;  %s3007_s0 = inlined_call_operand.vmem [shape: f32[32,4], index: 0, kind: input, shape index: {}]   ;;  %s3008_s1 = inlined_call_operand.vmem [shape: f32[4,128], index: 1, kind: input, shape index: {}]   ;;  %s3009_s2 = inlined_call_operand.vmem [shape: f32[1,128], index: 2, kind: input, shape index: {}]   ;;  %s3010_s3 = inlined_call_operand.vmem [shape: f32[3,128,32], index: 3, kind: input, shape index: {}]   ;;  %s3011_s4 = inlined_call_operand.vmem [shape: f32[1,32], index: 4, kind: input, shape index: {}]   ;;  %s3012_s5 = inlined_call_operand.hbm [shape: f32[32,32], index: 5, kind: output, shape index: {}]  }
   0x1   :  { %v25_v0 = vld [vmem:[%s3008_s1] sm:$0xf]  ;;  %v22_v2 = vld [vmem:[%s3007_s0 + $0x8] sm:$0xff]  ;;  %v23_v9 = vld [vmem:[%s3007_s0 + $0x10] sm:$0xff] }
   0x2   :  { %v21_v1 = vld [vmem:[%s3007_s0] sm:$0xff]  ;;  %v45_v3 = vsel %vm43_vm0, %v25_v0, 0  ;;  %v35_v5 = vsel %vm30_vm1, %v22_v2, 0 }
   0x3   :  { %v32_v4 = vsel %vm30_vm1, %v21_v1, 0  ;;  %v62_v6 = vand.u32 4294901760, %v45_v3  ;;  %v72_v8 = vand.u32 4294901760, %v35_v5 }
   0x4   :  { %v64_v7 = vand.u32 4294901760, %v32_v4 }
   0x5   :  { %10 = vsyncpa [#allocation3], 0  ;;  %v113_v10 = vsub.f32 %v45_v3, %v62_v6  ;;  %63 = vmatpush.msra.mxu0 %v62_v6  ;;  %190 = vmatpush.msra.mxu3 %v62_v6  ;;  %v73_v12 = vsub.f32 %v35_v5, %v72_v8  ;;  %v38_v13 = vsel %vm30_vm1, %v23_v9, 0  ;;  %v24_v22 = vld [vmem:[%s3007_s0 + $0x18] sm:$0xff]  ;;  %v1786_v37 = vld [vmem:[%s3010_s3 + $0xf0] sm:$0xff]  ;;  %vm1749_vm8 = vcmask 261120  }
   0x6   :  { %v65_v11 = vsub.f32 %v32_v4, %v64_v7  ;;  %v80_v19 = vand.u32 4294901760, %v38_v13  ;;  %v41_v25 = vsel %vm30_vm1, %v24_v22, 0  ;;  %v1787_v35 = vld [vmem:[%s3010_s3 + $0xf8] sm:$0xff]  ;;  %v1898_v39 = vand.u32 4294901760, %v1786_v37  ;;  %v1785_v40 = vld [vmem:[%s3010_s3 + $0xe8] sm:$0xff]  ;;  %v1784_v44 = vld [vmem:[%s3010_s3 + $0xe0] sm:$0xff] }
   0x7   :  { %152 = vmatpush.msra.mxu2 %v113_v10  ;;  %v114_v15 = vand.u32 4294901760, %v113_v10  ;;  %v74_v18 = vand.u32 4294901760, %v73_v12  ;;  %v88_v28 = vand.u32 4294901760, %v41_v25  ;;  %v1890_v36 = vand.u32 4294901760, %v1787_v35  ;;  %v1783_v49 = vld [vmem:[%s3010_s3 + $0xd8] sm:$0xff]  ;;  %v1782_v55 = vld [vmem:[%s3010_s3 + $0xd0] sm:$0xff] }
   0x8   :  { %v66_v14 = vand.u32 4294901760, %v65_v11  ;;  %155 = vmatmul.f32.vlgmr.msra.gmra.mxu2 %v65_v11  ;;  %v81_v24 = vsub.f32 %v38_v13, %v80_v19  ;;  %v1907_v42 = vsub.f32 %v1786_v37, %v1898_v39  ;;  %v1910_v43 = vand.u32 4294901760, %v1785_v40  ;;  %v1781_v61 = vld [vmem:[%s3010_s3 + $0xc8] sm:$0xff]  ;;  %v1780_v3 = vld [vmem:[%s3010_s3 + $0xc0] sm:$0xff]  ;;  %v1779_v9 = vld [vmem:[%s3010_s3 + $0xb8] sm:$0xff]  ;;  %s1760_s19 = sshll.u32 %s3012_s5, 4  ;;  %s1761_s19 = int_to_ptr.hbm [resolvable:$true] %s1760_s19 }
   0x9   :  { %234 = vmatpush.msrb.mxu0 %v114_v15  ;;  %v115_v17 = vsub.f32 %v113_v10, %v114_v15  ;;  %v75_v23 = vsub.f32 %v73_v12, %v74_v18  ;;  %v89_v30 = vsub.f32 %v41_v25, %v88_v28  ;;  %v1896_v38 = vsub.f32 %v1787_v35, %v1890_v36  ;;  %v1778_v15 = vld [vmem:[%s3010_s3 + $0xb0] sm:$0xff]  ;;  %s1836_s20 = smov 128   ;;  %s1837_s21 = smov 8  }
   0xa   :  { %v67_v16 = vsub.f32 %v65_v11, %v66_v14  ;;  %194 = vmatmul.f32.vlgmr.msra.gmra.mxu3 %v66_v14  ;;  %v82_v27 = vand.u32 4294901760, %v81_v24  ;;  %399 = vmatpush.msrb.mxu2 %v1890_v36  ;;  %v471_v46 = vand.u32 4294901760, %v1907_v42  ;;  %v1922_v47 = vsub.f32 %v1785_v40, %v1910_v43 }
   0xb   :  { %v116_v21 = vand.u32 4294901760, %v115_v17  ;;  %v76_v26 = vand.u32 4294901760, %v75_v23  ;;  %v90_v32 = vand.u32 4294901760, %v89_v30  ;;  %v465_v41 = vand.u32 4294901760, %v1896_v38 }
   0xc   :  { %v68_v20 = vand.u32 4294901760, %v67_v16  ;;  %v83_v29 = vsub.f32 %v81_v24, %v82_v27  ;;  %401 = vmatpush.msrb.mxu2 %v1898_v39  ;;  %v1925_v48 = vand.u32 4294901760, %v1784_v44  ;;  %v472_v51 = vsub.f32 %v1907_v42, %v471_v46 }
   0xd   :  { %117 = vmatpush.msra.mxu1 %v116_v21  ;;  %v91_v33 = vsub.f32 %v89_v30, %v90_v32  ;;  %v466_v45 = vsub.f32 %v1896_v38, %v465_v41  ;;  %v477_v52 = vand.u32 4294901760, %v1922_v47  ;;  %v1941_v54 = vand.u32 4294901760, %v1783_v49  ;;  %v1777_v21 = vld [vmem:[%s3010_s3 + $0xa8] sm:$0xff] }
   0xe   :  { %69 = vmatmul.f32.vlgmr.msra.gmra.mxu0 %v68_v20  ;;  %119 = vmatmul.f32.vlgmr.msra.gmra.mxu1 %v64_v7  ;;  %v84_v31 = vand.u32 4294901760, %v83_v29  ;;  %v1937_v53 = vsub.f32 %v1784_v44, %v1925_v48  ;;  %v473_v56 = vand.u32 4294901760, %v472_v51  ;;  %v1952_v59 = vand.u32 4294901760, %v1782_v55 }
   0xf   :  { %268 = vmatpush.msrb.mxu1 %v62_v6  ;;  %v92_v34 = vand.u32 4294901760, %v91_v33  ;;  %578 = vmatpush.msra.mxu0 %v1896_v38  ;;  %v467_v50 = vand.u32 4294901760, %v466_v45  ;;  %v478_v57 = vsub.f32 %v1922_v47, %v477_v52  ;;  %v1955_v60 = vsub.f32 %v1783_v49, %v1941_v54  ;;  %v1775_v33 = vld [vmem:[%s3010_s3 + $0x98] sm:$0xff]  ;;  %v2156_v38 = vld [vmem:[%s3009_s2] ss:$0 sm:$0xff] }
  0x10   :  { %160 = vmatmul.f32.gmra.mxu2 %v73_v12  ;;  %v483_v58 = vand.u32 4294901760, %v1937_v53  ;;  %v1966_v0 = vsub.f32 %v1782_v55, %v1952_v59  ;;  %v1968_v1 = vand.u32 4294901760, %v1781_v61  ;;  %v1998_v13 = vand.u32 4294901760, %v1779_v9 }
  0x11   :  { %646 = vmatpush.msra.mxu1 %v1890_v36  ;;  %581 = vmatpush.msra.mxu0 %v1907_v42  ;;  %v479_v62 = vand.u32 4294901760, %v478_v57  ;;  %v489_v2 = vand.u32 4294901760, %v1955_v60  ;;  %v2015_v20 = vand.u32 4294901760, %v1778_v15  ;;  %v2024_v25 = vand.u32 4294901760, %v1777_v21  ;;  %v378_v42 = vld [vmem:[%s3010_s3 + $0x68] sm:$0xff] }
  0x12   :  { %200 = vmatmul.f32.gmra.mxu3 %v74_v18  ;;  %403 = vmatpush.msrb.mxu2 %v1910_v43  ;;  %v484_v63 = vsub.f32 %v1937_v53, %v483_v58  ;;  %v495_v5 = vand.u32 4294901760, %v1966_v0  ;;  %v1978_v6 = vsub.f32 %v1781_v61, %v1968_v1  ;;  %v2056_v44 = vand.u32 4294901760, %v1775_v33 }
  0x13   :  { %648 = vmatpush.msra.mxu1 %v1898_v39  ;;  %584 = vmatpush.msra.mxu0 %v1922_v47 }
  0x14   :  { %405 = vmatpush.msrb.mxu2 %v1925_v48  ;;  %468 = vmatpush.msrb.mxu3 %v467_v50  ;;  %v485_v4 = vand.u32 4294901760, %v484_v63  ;;  %v496_v10 = vsub.f32 %v1966_v0, %v495_v5  ;;  %v501_v11 = vand.u32 4294901760, %v1978_v6  ;;  %v1774_v50 = vld [vmem:[%s3010_s3 + $0x90] sm:$0xff] }
  0x15   :  { %650 = vmatpush.msra.mxu1 %v1910_v43  ;;  %587 = vmatpush.msra.mxu0 %v1937_v53  ;;  %v2076_v57 = vand.u32 4294901760, %v1774_v50  ;;  %v376_v53 = vld [vmem:[%s3010_s3 + $0x58] sm:$0xff] }
  0x16   :  { %77 = vmatmul.f32.gmra.mxu0 %v76_v26  ;;  %123 = vmatmul.f32.gmra.mxu1 %v72_v8  ;;  %v497_v16 = vand.u32 4294901760, %v496_v10  ;;  %v502_v17 = vsub.f32 %v1978_v6, %v501_v11  ;;  %v2029_v26 = vsub.f32 %v1778_v15, %v2015_v20  ;;  %v1772_v10 = vld [vmem:[%s3010_s3 + $0x80] sm:$0xff] }
  0x17   :  { %652 = vmatpush.msra.mxu1 %v1925_v48  ;;  %407 = vmatpush.msrb.mxu2 %v1941_v54 }
  0x18   :  { %165 = vmatmul.f32.gmra.mxu2 %v81_v24  ;;  %474 = vmatpush.msrb.mxu3 %v473_v56  ;;  %v503_v22 = vand.u32 4294901760, %v502_v17  ;;  %v2074_v56 = vsub.f32 %v1775_v33, %v2056_v44  ;;  %v2103_v17 = vand.u32 4294901760, %v1772_v10 }
  0x19   :  { %654 = vmatpush.msra.mxu1 %v1941_v54  ;;  %590 = vmatpush.msra.mxu0 %v1955_v60 }
  0x1a   :  { %206 = vmatmul.f32.gmra.mxu3 %v82_v27  ;;  %409 = vmatpush.msrb.mxu2 %v1952_v59  ;;  %v1776_v27 = vld [vmem:[%s3010_s3 + $0xa0] sm:$0xff] }
  0x1b   :  { %656 = vmatpush.msra.mxu1 %v1952_v59  ;;  %480 = vmatpush.msrb.mxu3 %v479_v62  ;;  %v1773_v62 = vld [vmem:[%s3010_s3 + $0x88] sm:$0xff] }
  0x1c   :  { %593 = vmatpush.msra.mxu0 %v1966_v0  ;;  %411 = vmatpush.msrb.mxu2 %v1968_v1 }
  0x1d   :  { %658 = vmatpush.msra.mxu1 %v1968_v1  ;;  %486 = vmatpush.msrb.mxu3 %v485_v4  ;;  %v537_v4 = vand.u32 4294901760, %v2074_v56 }
  0x1e   :  { %85 = vmatmul.f32.gmra.mxu0 %v84_v31  ;;  %127 = vmatmul.f32.gmra.mxu1 %v80_v19  ;;  %v2041_v31 = vand.u32 4294901760, %v1776_v27 }
  0x1f   :  { %596 = vmatpush.msra.mxu0 %v1978_v6  ;;  %v538_v15 = vsub.f32 %v2074_v56, %v537_v4 }
  0x20   :  { %170 = vmatmul.f32.gmra.mxu2 %v89_v30  ;;  %v2039_v30 = vsub.f32 %v1777_v21, %v2024_v25  ;;  %v2054_v40 = vsub.f32 %v1776_v27, %v2041_v31 }
  0x22   :  { %212 = vmatmul.f32.gmra.mxu3 %v90_v32  ;;  %v519_v32 = vand.u32 4294901760, %v2029_v26  ;;  %v525_v37 = vand.u32 4294901760, %v2039_v30  ;;  %v531_v55 = vand.u32 4294901760, %v2054_v40 }
  0x24   :  { %v520_v49 = vsub.f32 %v2029_v26, %v519_v32  ;;  %v526_v51 = vsub.f32 %v2039_v30, %v525_v37 }
  0x26   :  { %93 = vmatmul.f32.gmra.mxu0 %v92_v34  ;;  %131 = vmatmul.f32.gmra.mxu1 %v88_v28  ;;  %v521_v61 = vand.u32 4294901760, %v520_v49  ;;  %v527_v63 = vand.u32 4294901760, %v526_v51  ;;  %v380_v51 = vld [vmem:[%s3010_s3 + $0x78] sm:$0xff] }
  0x2e   :  { %236 = vmatmul.f32.vlgmr.msrb.gmra.mxu0 %v64_v7  ;;  %270 = vmatmul.f32.vlgmr.msrb.gmra.mxu1 %v64_v7  ;;  %v1980_v7 = vand.u32 4294901760, %v1780_v3 }
  0x30   :  { %v1996_v12 = vsub.f32 %v1780_v3, %v1980_v7  ;;  %660 = vmatpush.msra.mxu1 %v1980_v7  ;;  %413 = vmatpush.msrb.mxu2 %v1980_v7  ;;  %v532_v3 = vsub.f32 %v2054_v40, %v531_v55 }
  0x32   :  { %v507_v18 = vand.u32 4294901760, %v1996_v12  ;;  %599 = vmatpush.msra.mxu0 %v1996_v12  ;;  %662 = vmatpush.msra.mxu1 %v1998_v13 }
  0x33   :  { %415 = vmatpush.msrb.mxu2 %v1998_v13 }
  0x34   :  { %v508_v23 = vsub.f32 %v1996_v12, %v507_v18  ;;  %664 = vmatpush.msra.mxu1 %v2015_v20 }
  0x35   :  { %417 = vmatpush.msrb.mxu2 %v2015_v20 }
  0x36   :  { %240 = vmatmul.f32.gmra.mxu0 %v72_v8  ;;  %274 = vmatmul.f32.gmra.mxu1 %v72_v8  ;;  %v490_v8 = vsub.f32 %v1955_v60, %v489_v2 }
  0x37   :  { %666 = vmatpush.msra.mxu1 %v2024_v25  ;;  %419 = vmatpush.msrb.mxu2 %v2024_v25 }
  0x38   :  { %v491_v14 = vand.u32 4294901760, %v490_v8  ;;  %v2089_v8 = vsub.f32 %v1774_v50, %v2076_v57 }
  0x39   :  { %668 = vmatpush.msra.mxu1 %v2041_v31  ;;  %421 = vmatpush.msrb.mxu2 %v2041_v31 }
  0x3a   :  { %492 = vmatpush.msrb.mxu3 %v491_v14  ;;  %v533_v14 = vand.u32 4294901760, %v532_v3  ;;  %v379_v3 = vld [vmem:[%s3010_s3 + $0x70] sm:$0xff] }
  0x3b   :  { %670 = vmatpush.msra.mxu1 %v2056_v44  ;;  %423 = vmatpush.msrb.mxu2 %v2056_v44 }
  0x3c   :  { %498 = vmatpush.msrb.mxu3 %v497_v16  ;;  %v543_v16 = vand.u32 4294901760, %v2089_v8 }
  0x3d   :  { %672 = vmatpush.msra.mxu1 %v2076_v57  ;;  %425 = vmatpush.msrb.mxu2 %v2076_v57 }
  0x3e   :  { %244 = vmatmul.f32.gmra.mxu0 %v80_v19  ;;  %278 = vmatmul.f32.gmra.mxu1 %v80_v19  ;;  %v2011_v19 = vsub.f32 %v1779_v9, %v1998_v13  ;;  %v2094_v9 = vand.u32 4294901760, %v1773_v62  ;;  %v544_v27 = vsub.f32 %v2089_v8, %v543_v16 }
  0x3f   :  { %504 = vmatpush.msrb.mxu3 %v503_v22 }
  0x40   :  { %v513_v24 = vand.u32 4294901760, %v2011_v19  ;;  %602 = vmatpush.msra.mxu0 %v2011_v19  ;;  %v2108_v21 = vsub.f32 %v1773_v62, %v2094_v9  ;;  %674 = vmatpush.msra.mxu1 %v2094_v9  ;;  %v2138_v62 = vand.u32 4294901760, %v380_v51 }
  0x41   :  { %427 = vmatpush.msrb.mxu2 %v2094_v9 }
  0x42   :  { %v514_v29 = vsub.f32 %v2011_v19, %v513_v24  ;;  %605 = vmatpush.msra.mxu0 %v2029_v26  ;;  %v549_v33 = vand.u32 4294901760, %v2108_v21  ;;  %676 = vmatpush.msra.mxu1 %v2103_v17 }
  0x43   :  { %429 = vmatpush.msrb.mxu2 %v2103_v17 }
  0x44   :  { %v515_v35 = vand.u32 4294901760, %v514_v29  ;;  %608 = vmatpush.msra.mxu0 %v2039_v30  ;;  %v550_v50 = vsub.f32 %v2108_v21, %v549_v33 }
  0x45   :  { %705 = vmatpush.msra.mxu2 %v465_v41 }
  0x46   :  { %248 = vmatmul.f32.gmra.mxu0 %v88_v28  ;;  %282 = vmatmul.f32.gmra.mxu1 %v88_v28  ;;  %v509_v28 = vand.u32 4294901760, %v508_v23  ;;  %v539_v23 = vand.u32 4294901760, %v538_v15  ;;  %v2149_v15 = vand.u32 4294901760, %v379_v3 }
  0x47   :  { %611 = vmatpush.msra.mxu0 %v2054_v40  ;;  %709 = vmatpush.msra.mxu2 %v471_v46 }
  0x48   :  { %510 = vmatpush.msrb.mxu3 %v509_v28  ;;  %v2117_v28 = vsub.f32 %v1772_v10, %v2103_v17 }
  0x49   :  { %614 = vmatpush.msra.mxu0 %v2074_v56  ;;  %713 = vmatpush.msra.mxu2 %v477_v52 }
  0x4a   :  { %516 = vmatpush.msrb.mxu3 %v515_v35  ;;  %v545_v35 = vand.u32 4294901760, %v544_v27  ;;  %v555_v49 = vand.u32 4294901760, %v2117_v28  ;;  %v2163_v27 = vsub.f32 %v379_v3, %v2149_v15 }
  0x4b   :  { %617 = vmatpush.msra.mxu0 %v2089_v8  ;;  %717 = vmatpush.msra.mxu2 %v483_v58 }
  0x4c   :  { %522 = vmatpush.msrb.mxu3 %v521_v61  ;;  %v556_v61 = vsub.f32 %v2117_v28, %v555_v49 }
  0x4d   :  { %620 = vmatpush.msra.mxu0 %v2108_v21  ;;  %721 = vmatpush.msra.mxu2 %v489_v2 }
  0x4e   :  { %528 = vmatpush.msrb.mxu3 %v527_v63  ;;  %v551_v63 = vand.u32 4294901760, %v550_v50  ;;  %v557_v10 = vand.u32 4294901760, %v556_v61  ;;  %v2172_v50 = vand.u32 4294901760, %v378_v42  ;;  %v3013_v61 = vand.u32 4294901760, %v2163_v27 }
  0x4f   :  { %623 = vmatpush.msra.mxu0 %v2117_v28  ;;  %725 = vmatpush.msra.mxu2 %v495_v5 }
  0x50   :  { %534 = vmatpush.msrb.mxu3 %v533_v14  ;;  %v2147_v14 = vsub.f32 %v380_v51, %v2138_v62 }
  0x51   :  { %833 = vmatpush.msrb.mxu0 %v2138_v62  ;;  %729 = vmatpush.msra.mxu2 %v501_v11 }
  0x52   :  { %540 = vmatpush.msrb.mxu3 %v539_v23  ;;  %v3014_v23 = vand.u32 4294901760, %v2147_v14 }
  0x53   :  { %835 = vmatpush.msrb.mxu0 %v2149_v15  ;;  %733 = vmatpush.msra.mxu2 %v507_v18 }
  0x54   :  { %546 = vmatpush.msrb.mxu3 %v545_v35  ;;  %v900_v51 = vsub.f32 %v2147_v14, %v3014_v23 }
  0x55   :  { %837 = vmatpush.msrb.mxu0 %v2172_v50  ;;  %737 = vmatpush.msra.mxu2 %v513_v24 }
  0x56   :  { %552 = vmatpush.msrb.mxu3 %v551_v63  ;;  %v377_v63 = vld [vmem:[%s3010_s3 + $0x60] sm:$0xff]  ;;  %v901_v3 = vand.u32 4294901760, %v900_v51 }
  0x57   :  { %v2190_v52 = vand.u32 4294901760, %v377_v63  ;;  %741 = vmatpush.msra.mxu2 %v519_v32 }
  0x58   :  { %558 = vmatpush.msrb.mxu3 %v557_v10  ;;  %v906_v10 = vsub.f32 %v2163_v27, %v3013_v61  ;;  %902 = vmatpush.msrb.mxu1 %v901_v3  ;;  %v375_v61 = vld [vmem:[%s3010_s3 + $0x50] sm:$0xff] }
  0x59   :  { %839 = vmatpush.msrb.mxu0 %v2190_v52  ;;  %745 = vmatpush.msra.mxu2 %v525_v37 }
  0x5a   :  { %784 = vmatpush.msra.mxu3 %v1890_v36  ;;  %v2188_v36 = vsub.f32 %v378_v42, %v2172_v50  ;;  %v2204_v42 = vsub.f32 %v377_v63, %v2190_v52  ;;  %v907_v51 = vand.u32 4294901760, %v906_v10 }
  0x5b   :  { %749 = vmatpush.msra.mxu2 %v531_v55 }
  0x5c   :  { %786 = vmatpush.msra.mxu3 %v1898_v39  ;;  %v2206_v39 = vand.u32 4294901760, %v376_v53  ;;  %v3015_v23 = vand.u32 4294901760, %v2204_v42  ;;  %908 = vmatpush.msrb.mxu1 %v907_v51 }
  0x5d   :  { %753 = vmatpush.msra.mxu2 %v537_v4 }
  0x5e   :  { %788 = vmatpush.msra.mxu3 %v1910_v43  ;;  %841 = vmatpush.msrb.mxu0 %v2206_v39  ;;  %v2219_v63 = vsub.f32 %v376_v53, %v2206_v39  ;;  %v918_v53 = vsub.f32 %v2204_v42, %v3015_v23 }
  0x5f   :  { %757 = vmatpush.msra.mxu2 %v543_v16 }
  0x60   :  { %790 = vmatpush.msra.mxu3 %v1925_v48  ;;  %v923_v0 = vand.u32 4294901760, %v2219_v63  ;;  %v919_v6 = vand.u32 4294901760, %v918_v53  ;;  %v371_v53 = vld [vmem:[%s3010_s3 + $0x30] sm:$0xff] }
  0x61   :  { %761 = vmatpush.msra.mxu2 %v549_v33 }
  0x62   :  { %792 = vmatpush.msra.mxu3 %v1941_v54  ;;  %v924_v11 = vsub.f32 %v2219_v63, %v923_v0 }
  0x63   :  { %765 = vmatpush.msra.mxu2 %v555_v49 }
  0x64   :  { %794 = vmatpush.msra.mxu3 %v1952_v59 }
  0x66   :  { %796 = vmatpush.msra.mxu3 %v1968_v1  ;;  %v2288_v1 = vand.u32 4294901760, %v371_v53 }
  0x68   :  { %798 = vmatpush.msra.mxu3 %v1980_v7  ;;  %v2307_v7 = vsub.f32 %v371_v53, %v2288_v1 }
  0x6a   :  { %800 = vmatpush.msra.mxu3 %v1998_v13  ;;  %v953_v30 = vand.u32 4294901760, %v2307_v7 }
  0x6c   :  { %802 = vmatpush.msra.mxu3 %v2015_v20  ;;  %v954_v40 = vsub.f32 %v2307_v7, %v953_v30 }
  0x6e   :  { %804 = vmatpush.msra.mxu3 %v2024_v25 }
  0x70   :  { %806 = vmatpush.msra.mxu3 %v2041_v31 }
  0x72   :  { %808 = vmatpush.msra.mxu3 %v2056_v44 }
  0x74   :  { %810 = vmatpush.msra.mxu3 %v2076_v57 }
  0x76   :  { %812 = vmatpush.msra.mxu3 %v2094_v9 }
  0x78   :  { %814 = vmatpush.msra.mxu3 %v2103_v17 }
  0x8b   :  { %v2050_v34 = vpop.f32.mrf.mxu0  ;;  %v2060_v45 = vpop.f32.mrf.mxu1 }
  0x8c   :  { %v156_v46 = vpop.f32.mrf.mxu2  ;;  %v71_v47 = vadd.f32 %v2156_v38, %v2050_v34  ;;  %v3016_v34 = vand.u32 4294901760, %v2188_v36 }
  0x8d   :  { %v195_v58 = vpop.f32.mrf.mxu3 }
  0x8e   :  { %v121_v60 = vadd.f32 %v2060_v45, %v71_v47  ;;  %v912_v2 = vsub.f32 %v2188_v36, %v3016_v34  ;;  %v2226_v45 = vand.u32 4294901760, %v375_v61  ;;  %v374_v47 = vld [vmem:[%s3010_s3 + $0x48] sm:$0xff] }
  0x8f   :  { %v2246_v51 = vand.u32 4294901760, %v374_v47 }
  0x90   :  { %v913_v10 = vand.u32 4294901760, %v912_v2  ;;  %843 = vmatpush.msrb.mxu0 %v2226_v45  ;;  %v2244_v5 = vsub.f32 %v375_v61, %v2226_v45  ;;  %v373_v2 = vld [vmem:[%s3010_s3 + $0x40] sm:$0xff]  ;;  %v157_v23 = vadd.f32 %v156_v46, %v121_v60  ;;  %v372_v61 = vld [vmem:[%s3010_s3 + $0x38] sm:$0xff]  ;;  %v925_v60 = vand.u32 4294901760, %v924_v11 }
  0x91   :  { %v2254_v54 = vand.u32 4294901760, %v373_v2  ;;  %v2262_v46 = vsub.f32 %v374_v47, %v2246_v51  ;;  %v2270_v12 = vand.u32 4294901760, %v372_v61 }
  0x92   :  { %914 = vmatpush.msrb.mxu1 %v913_v10  ;;  %845 = vmatpush.msrb.mxu0 %v2246_v51 }
  0x93   :  { %v2111_v22 = vpop.f32.mrf.mxu0  ;;  %v2121_v29 = vpop.f32.mrf.mxu1  ;;  %v2268_v10 = vsub.f32 %v373_v2, %v2254_v54  ;;  %v3017_v47 = vand.u32 4294901760, %v2262_v46  ;;  %v196_v2 = vadd.f32 %v195_v58, %v157_v23  ;;  %v2286_v24 = vsub.f32 %v372_v61, %v2270_v12  ;;  %v370_v58 = vld [vmem:[%s3010_s3 + $0x28] sm:$0xff] }
  0x94   :  { %v79_v48 = vadd.f32 %v2156_v38, %v2111_v22  ;;  %v161_v34 = vpop.f32.mrf.mxu2  ;;  %v929_v22 = vand.u32 4294901760, %v2244_v5  ;;  %920 = vmatpush.msrb.mxu1 %v919_v6  ;;  %847 = vmatpush.msrb.mxu0 %v2254_v54 }
  0x95   :  { %v201_v6 = vpop.f32.mrf.mxu3  ;;  %v3018_v19 = vand.u32 4294901760, %v2268_v10  ;;  %v936_v23 = vsub.f32 %v2262_v46, %v3017_v47  ;;  %v2312_v47 = vand.u32 4294901760, %v370_v58 }
  0x96   :  { %v125_v59 = vadd.f32 %v2121_v29, %v79_v48  ;;  %v930_v18 = vsub.f32 %v2244_v5, %v929_v22  ;;  %926 = vmatpush.msrb.mxu1 %v925_v60  ;;  %849 = vmatpush.msrb.mxu0 %v2270_v12 }
  0x97   :  { %v942_v32 = vsub.f32 %v2268_v10, %v3018_v19  ;;  %v2329_v37 = vsub.f32 %v370_v58, %v2312_v47  ;;  %v367_v58 = vld [vmem:[%s3010_s3 + $0x10] sm:$0xff] }
  0x98   :  { %v931_v11 = vand.u32 4294901760, %v930_v18  ;;  %v162_v60 = vadd.f32 %v161_v34, %v125_v59  ;;  %v937_v18 = vand.u32 4294901760, %v936_v23  ;;  %851 = vmatpush.msrb.mxu0 %v2288_v1  ;;  %v368_v59 = vld [vmem:[%s3010_s3 + $0x18] sm:$0xff]  ;;  %v2357_v4 = vand.u32 4294901760, %v367_v58 }
  0x99   :  { %v943_v19 = vand.u32 4294901760, %v942_v32  ;;  %v2341_v20 = vand.u32 4294901760, %v368_v59  ;;  %v955_v32 = vand.u32 4294901760, %v954_v40  ;;  %v365_v40 = vld [vmem:[%s3010_s3] sm:$0xff] }
  0x9a   :  { %932 = vmatpush.msrb.mxu1 %v931_v11  ;;  %853 = vmatpush.msrb.mxu0 %v2312_v47  ;;  %v202_v55 = vadd.f32 %v201_v6, %v162_v60  ;;  %v2372_v31 = vsub.f32 %v367_v58, %v2357_v4  ;;  %v2398_v58 = vand.u32 4294901760, %v365_v40 }
  0x9b   :  { %v2158_v41 = vpop.f32.mrf.mxu0  ;;  %v2170_v35 = vpop.f32.mrf.mxu1  ;;  %v2355_v56 = vsub.f32 %v368_v59, %v2341_v20 }
  0x9c   :  { %v87_v29 = vadd.f32 %v2156_v38, %v2158_v41  ;;  %v947_v41 = vand.u32 4294901760, %v2286_v24  ;;  %938 = vmatpush.msrb.mxu1 %v937_v18  ;;  %v166_v11 = vpop.f32.mrf.mxu2  ;;  %v366_v18 = vld [vmem:[%s3010_s3 + $0x8] sm:$0xff]  ;;  %v977_v44 = vand.u32 4294901760, %v2372_v31  ;;  %v2411_v49 = vsub.f32 %v365_v40, %v2398_v58 }
  0x9d   :  { %v971_v16 = vand.u32 4294901760, %v2355_v56 }
  0x9e   :  { %v948_v53 = vsub.f32 %v2286_v24, %v947_v41  ;;  %v129_v13 = vadd.f32 %v2170_v35, %v87_v29  ;;  %944 = vmatpush.msrb.mxu1 %v943_v19  ;;  %v959_v35 = vand.u32 4294901760, %v2329_v37 }
  0x9f   :  { %v972_v33 = vsub.f32 %v2355_v56, %v971_v16 }
  0xa0   :  { %v167_v25 = vadd.f32 %v166_v11, %v129_v13  ;;  %v960_v19 = vsub.f32 %v2329_v37, %v959_v35 }
  0xa2   :  { %v961_v11 = vand.u32 4294901760, %v960_v19  ;;  %v978_v19 = vsub.f32 %v2372_v31, %v977_v44 }
  0xa3   :  { %v2223_v43 = vpop.f32.mrf.mxu0  ;;  %v2231_v3 = vpop.f32.mrf.mxu1 }
  0xa4   :  { %v95_v13 = vadd.f32 %v2156_v38, %v2223_v43 }
  0xa6   :  { %v133_v28 = vadd.f32 %v2231_v3, %v95_v13  ;;  %v979_v3 = vand.u32 4294901760, %v978_v19  ;;  %v989_v13 = vand.u32 4294901760, %v2411_v49 }
  0xa8   :  { %v990_v17 = vsub.f32 %v2411_v49, %v989_v13 }
  0xab   :  { %v237_v48 = vpop.f32.mrf.mxu0  ;;  %v271_v26 = vpop.f32.mrf.mxu1 }
  0xac   :  { %v238_v61 = vadd.f32 %v237_v48, %v196_v2  ;;  %v369_v2 = vld [vmem:[%s3010_s3 + $0x20] sm:$0xff] }
  0xad   :  { %v2331_v34 = vand.u32 4294901760, %v369_v2 }
  0xae   :  { %v2317_v48 = vadd.f32 %v271_v26, %v238_v61  ;;  %v949_v61 = vand.u32 4294901760, %v948_v53 }
  0xaf   :  { %v2348_v29 = vsub.f32 %v369_v2, %v2331_v34  ;;  %855 = vmatpush.msrb.mxu0 %v2331_v34  ;;  %v207_v2 = vpop.f32.mrf.mxu3 }
  0xb0   :  { %v286_v23 = vadd.f32 3.0, %v2317_v48  ;;  %950 = vmatpush.msrb.mxu1 %v949_v61  ;;  %v2382_v61 = vand.u32 4294901760, %v366_v18 }
  0xb1   :  { %v965_v60 = vand.u32 4294901760, %v2348_v29  ;;  %857 = vmatpush.msrb.mxu0 %v2341_v20 }
  0xb2   :  { %v290_v26 = vmax.f32 %v286_v23, 0.0  ;;  %956 = vmatpush.msrb.mxu1 %v955_v32  ;;  %v2396_v43 = vsub.f32 %v366_v18, %v2382_v61  ;;  %v208_v18 = vadd.f32 %v207_v2, %v167_v25 }
  0xb3   :  { %v241_v6 = vpop.f32.mrf.mxu0  ;;  %v275_v8 = vpop.f32.mrf.mxu1  ;;  %v966_v23 = vsub.f32 %v2348_v29, %v965_v60  ;;  %859 = vmatpush.msrb.mxu0 %v2357_v4 }
  0xb4   :  { %v294_v53 = vmin.f32 %v290_v26, 6.0  ;;  %v242_v59 = vadd.f32 %v241_v6, %v202_v55  ;;  %962 = vmatpush.msrb.mxu1 %v961_v11  ;;  %v973_v6 = vand.u32 4294901760, %v972_v33  ;;  %v983_v57 = vand.u32 4294901760, %v2396_v43 }
  0xb5   :  { %v967_v38 = vand.u32 4294901760, %v966_v23  ;;  %861 = vmatpush.msrb.mxu0 %v2382_v61 }
  0xb6   :  { %v298_v55 = vmul.f32 0.16666667, %v294_v53  ;;  %v276_v21 = vadd.f32 %v275_v8, %v242_v59  ;;  %v171_v53 = vpop.f32.mrf.mxu2  ;;  %v984_v9 = vsub.f32 %v2396_v43, %v983_v57 }
  0xb7   :  { %968 = vmatpush.msrb.mxu1 %v967_v38  ;;  %863 = vmatpush.msrb.mxu0 %v2398_v58 }
  0xb8   :  { %v2401_v26 = vmul.f32 %v298_v55, %v2317_v48  ;;  %v287_v32 = vadd.f32 3.0, %v276_v21  ;;  %v306_v48 = vlaneseq  ;;  %v172_v55 = vadd.f32 %v171_v53, %v133_v28 }
  0xb9   :  { %974 = vmatpush.msrb.mxu1 %v973_v6  ;;  %v985_v33 = vand.u32 4294901760, %v984_v9 }
  0xba   :  { %v291_v59 = vmax.f32 %v287_v32, 0.0  ;;  %v2414_v8 = vand.u32 4294901760, %v2401_v26  ;;  %v2429_v38 = vshrl.u32 %v306_v48, 7  ;;  %v213_v32 = vpop.f32.mrf.mxu3 }
  0xbb   :  { %v245_v11 = vpop.f32.mrf.mxu0  ;;  %v279_v2 = vpop.f32.mrf.mxu1  ;;  %980 = vmatpush.msrb.mxu1 %v979_v3  ;;  %v3024_v3 = vand.u32 4294901760, %v2147_v14  ;;  %v214_v9 = vadd.f32 %v213_v32, %v172_v55 }
  0xbc   :  { %v295_v23 = vmin.f32 %v291_v59, 6.0  ;;  %v246_v25 = vadd.f32 %v245_v11, %v208_v18  ;;  %560 = vmatmul.f32.vlgmr.msrb.gmra.mxu3 %v2414_v8  ;;  %v431_v40 = vsub.f32 %v2401_v26, %v2414_v8  ;;  %v991_v59 = vand.u32 4294901760, %v990_v17 }
  0xbd   :  { %1080 = vmatpush.msrb.mxu3 %v2138_v62  ;;  %986 = vmatpush.msrb.mxu1 %v985_v33  ;;  %vm336_vm2 = vcmp.lt.s32.totalorder %v2429_v38, 7  ;;  %v308_v48 = vadd.s32 8, %v2429_v38  ;;  %vm327_vm4 = vcmp.lt.s32.totalorder %v2429_v38, 1 }
  0xbe   :  { %v299_v6 = vmul.f32 0.16666667, %v295_v23  ;;  %v280_v19 = vadd.f32 %v279_v2, %v246_v25  ;;  %626 = vmatmul.f32.vlgmr.msra.gmra.mxu0 %v431_v40  ;;  %v432_v18 = vand.u32 4294901760, %v431_v40  ;;  %v332_v23 = vrot.slane %v2401_v26, 1 }
  0xbf   :  { %1082 = vmatpush.msrb.mxu3 %v2149_v15  ;;  %1139 = vmatpush.msra.mxu0 %v3024_v3 }
  0xc0   :  { %v2432_v28 = vmul.f32 %v299_v6, %v276_v21  ;;  %v288_v53 = vadd.f32 3.0, %v280_v19  ;;  %680 = vmatmul.f32.vlgmr.msra.gmra.mxu1 %v432_v18  ;;  %v433_v11 = vsub.f32 %v431_v40, %v432_v18  ;;  %v3025_v40 = vand.u32 4294901760, %v2163_v27 }
  0xc1   :  { %992 = vmatpush.msrb.mxu1 %v991_v59  ;;  %1084 = vmatpush.msrb.mxu3 %v2172_v50 }
  0xc2   :  { %v333_v25 = vrot.slane %v2432_v28, 1  ;;  %v292_v21 = vmax.f32 %v288_v53, 0.0  ;;  %v434_v2 = vand.u32 4294901760, %v433_v11  ;;  %1143 = vmatpush.msra.mxu0 %v3025_v40  ;;  %v2445_v55 = vand.u32 4294901760, %v2432_v28 }
  0xc3   :  { %1218 = vmatpush.msra.mxu1 %v2138_v62  ;;  %v249_v33 = vpop.f32.mrf.mxu0  ;;  %1086 = vmatpush.msrb.mxu3 %v2190_v52  ;;  %v283_v6 = vpop.f32.mrf.mxu1  ;;  %v3026_v11 = vand.u32 4294901760, %v2188_v36 }
  0xc4   :  { %v296_v17 = vmin.f32 %v292_v21, 6.0  ;;  %v250_v32 = vadd.f32 %v249_v33, %v214_v9  ;;  %435 = vmatmul.f32.vlgmr.msrb.gmra.mxu2 %v434_v2  ;;  %v2453_v62 = vsel %vm336_vm2, %v332_v23, %v333_v25  ;;  %564 = vmatmul.f32.gmra.mxu3 %v2445_v55  ;;  %v439_v18 = vsub.f32 %v2432_v28, %v2445_v55 }
  0xc5   :  { %1220 = vmatpush.msra.mxu1 %v2149_v15  ;;  %1012 = vmatpush.msrb.mxu2 %v2147_v14  ;;  %v312_v15 = vand.u32 15, %v308_v48  ;;  %v3027_v2 = vand.u32 4294901760, %v2204_v42 }
  0xc6   :  { %v300_v59 = vmul.f32 0.16666667, %v296_v17  ;;  %v284_v53 = vadd.f32 %v283_v6, %v250_v32  ;;  %1088 = vmatpush.msrb.mxu3 %v2206_v39  ;;  %1147 = vmatpush.msra.mxu0 %v3026_v11  ;;  %v440_v3 = vand.u32 4294901760, %v439_v18 }
  0xc7   :  { %631 = vmatmul.f32.gmra.mxu0 %v439_v18  ;;  %1222 = vmatpush.msra.mxu1 %v2172_v50  ;;  %vm320_vm3 = vcmp.eq.s32.totalorder %v312_v15, 15 }
  0xc8   :  { %v2463_v9 = vmul.f32 %v300_v59, %v280_v19  ;;  %v289_v21 = vadd.f32 3.0, %v284_v53  ;;  %1015 = vmatpush.msrb.mxu2 %v2163_v27  ;;  %1090 = vmatpush.msrb.mxu3 %v2226_v45  ;;  %v441_v14 = vsub.f32 %v439_v18, %v440_v3 }
  0xc9   :  { %686 = vmatmul.f32.gmra.mxu1 %v440_v3  ;;  %1151 = vmatpush.msra.mxu0 %v3027_v2  ;;  %v3031_v3 = vand.u32 4294901760, %v2268_v10 }
  0xca   :  { %v334_v40 = vrot.slane %v2463_v9, 1  ;;  %v293_v33 = vmax.f32 %v289_v21, 0.0  ;;  %v2471_v48 = vand.u32 4294901760, %v2463_v9  ;;  %1224 = vmatpush.msra.mxu1 %v2190_v52  ;;  %1018 = vmatpush.msrb.mxu2 %v2188_v36  ;;  %v442_v50 = vand.u32 4294901760, %v441_v14  ;;  %v1803_v14 = vld [vmem:[%s3010_s3 + $0x178] sm:$0xff] }
  0xcb   :  { %1092 = vmatpush.msrb.mxu3 %v2246_v51  ;;  %1155 = vmatpush.msra.mxu0 %v923_v0  ;;  %v311_v52 = vand.u32 15, %v2429_v38  ;;  %v324_v0 = vrot.slane %v2432_v28, 7 }
  0xcc   :  { %v297_v27 = vmin.f32 %v293_v33, 6.0  ;;  %v447_v19 = vsub.f32 %v2463_v9, %v2471_v48  ;;  %1226 = vmatpush.msra.mxu1 %v2206_v39  ;;  %1021 = vmatpush.msrb.mxu2 %v2204_v42  ;;  %v338_v36 = vsel %vm336_vm2, %v333_v25, %v334_v40  ;;  %v309_v42 = vadd.s32 16, %v2429_v38 }
  0xcd   :  { %443 = vmatmul.f32.gmra.mxu2 %v442_v50  ;;  %568 = vmatmul.f32.gmra.mxu3 %v2471_v48  ;;  %v2488_v17 = vsel %vm320_vm3, 0.0, %v338_v36  ;;  %v323_v39 = vrot.slane %v2401_v26, 7  ;;  %vm2502_vm5 = vcmp.eq.s32.totalorder %v311_v52, 0  ;;  %v310_v33 = vadd.s32 24, %v2429_v38 }
  0xce   :  { %v301_v32 = vmul.f32 0.16666667, %v297_v27  ;;  %v448_v6 = vand.u32 4294901760, %v447_v19  ;;  %1094 = vmatpush.msrb.mxu3 %v2254_v54  ;;  %1159 = vmatpush.msra.mxu0 %v929_v22  ;;  %v3030_v22 = vand.u32 4294901760, %v2262_v46  ;;  %v313_v21 = vand.u32 15, %v309_v42 }
  0xcf   :  { %636 = vmatmul.f32.gmra.mxu0 %v447_v19  ;;  %1228 = vmatpush.msra.mxu1 %v2226_v45 }
  0xd0   :  { %v2498_v25 = vmul.f32 %v301_v32, %v284_v53  ;;  %v449_v18 = vsub.f32 %v447_v19, %v448_v6  ;;  %1024 = vmatpush.msrb.mxu2 %v2219_v63  ;;  %1096 = vmatpush.msrb.mxu3 %v2270_v12  ;;  %v330_v53 = vsel %vm327_vm4, %v323_v39, %v324_v0  ;;  %v325_v63 = vrot.slane %v2463_v9, 7  ;;  %v1802_v19 = vld [vmem:[%s3010_s3 + $0x170] sm:$0xff] }
  0xd1   :  { %692 = vmatmul.f32.gmra.mxu1 %v448_v6  ;;  %1163 = vmatpush.msra.mxu0 %v3030_v22  ;;  %v2538_v27 = vand.u32 4294901760, %v330_v53  ;;  %vm2550_vm6 = vcmp.eq.s32.totalorder %v313_v21, 0 }
  0xd2   :  { %v326_v45 = vrot.slane %v2498_v25, 7  ;;  %v450_v59 = vand.u32 4294901760, %v449_v18  ;;  %v2510_v11 = vand.u32 4294901760, %v2498_v25  ;;  %1230 = vmatpush.msra.mxu1 %v2246_v51  ;;  %1027 = vmatpush.msrb.mxu2 %v2244_v5  ;;  %v335_v15 = vrot.slane %v2498_v25, 1 }
  0xd3   :  { %1098 = vmatpush.msrb.mxu3 %v2288_v1  ;;  %1167 = vmatpush.msra.mxu0 %v3031_v3  ;;  %v2532_v51 = vand.u32 4294901760, %v1803_v14  ;;  %v329_v32 = vsel %vm327_vm4, %v324_v0, %v325_v63  ;;  %v2577_v0 = vsub.f32 %v330_v53, %v2538_v27 }
  0xd4   :  { %v455_v2 = vsub.f32 %v2498_v25, %v2510_v11  ;;  %v331_v5 = vsel %vm327_vm4, %v326_v45, %v323_v39  ;;  %1232 = vmatpush.msra.mxu1 %v2254_v54  ;;  %1030 = vmatpush.msrb.mxu2 %v2262_v46  ;;  %v2548_v46 = vand.u32 4294901760, %v1802_v19  ;;  %v2569_v42 = vsel %vm336_vm2, %v334_v40, %v335_v15  ;;  %v1800_v40 = vld [vmem:[%s3010_s3 + $0x160] sm:$0xff] }
  0xd5   :  { %451 = vmatmul.f32.gmra.mxu2 %v450_v59  ;;  %572 = vmatmul.f32.gmra.mxu3 %v2510_v11  ;;  %v349_v50 = vsel %vm2502_vm5, 0.0, %v331_v5  ;;  %v2560_v6 = vsub.f32 %v1803_v14, %v2532_v51  ;;  %v351_v53 = vsel %vm2550_vm6, 0.0, %v329_v32  ;;  %v874_v21 = vand.u32 4294901760, %v2577_v0  ;;  %v1796_v32 = vld [vmem:[%s3010_s3 + $0x140] sm:$0xff] }
  0xd6   :  { %v456_v36 = vand.u32 4294901760, %v455_v2  ;;  %v2543_v54 = vand.u32 4294901760, %v349_v50  ;;  %1100 = vmatpush.msrb.mxu3 %v2312_v47  ;;  %1171 = vmatpush.msra.mxu0 %v947_v41  ;;  %v1801_v41 = vld [vmem:[%s3010_s3 + $0x168] sm:$0xff]  ;;  %v2623_v14 = vand.u32 4294901760, %v351_v53  ;;  %v2692_v25 = vand.u32 4294901760, %v1796_v32 }
  0xd7   :  { %641 = vmatmul.f32.gmra.mxu0 %v455_v2  ;;  %1234 = vmatpush.msra.mxu1 %v2270_v12  ;;  %v314_v12 = vand.u32 15, %v310_v33  ;;  %v2581_v28 = vand.u32 4294901760, %v1801_v41  ;;  %v1350_v26 = vand.u32 4294901760, %v2560_v6 }
  0xd8   :  { %v457_v39 = vsub.f32 %v455_v2, %v456_v36  ;;  %v2572_v18 = vsub.f32 %v349_v50, %v2543_v54  ;;  %1033 = vmatpush.msrb.mxu2 %v2268_v10  ;;  %1102 = vmatpush.msrb.mxu3 %v2331_v34  ;;  %v340_v10 = vsel %vm336_vm2, %v335_v15, %v332_v23  ;;  %v2602_v23 = vand.u32 4294901760, %v1800_v40  ;;  %v1799_v15 = vld [vmem:[%s3010_s3 + $0x158] sm:$0xff] }
  0xd9   :  { %698 = vmatmul.f32.gmra.mxu1 %v456_v36  ;;  %1175 = vmatpush.msra.mxu0 %v953_v30  ;;  %v2596_v30 = vsub.f32 %v1802_v19, %v2548_v46  ;;  %vm2617_vm7 = vcmp.eq.s32.totalorder %v314_v12, 15  ;;  %v1351_v33 = vsub.f32 %v2560_v6, %v1350_v26  ;;  %v1797_v19 = vld [vmem:[%s3010_s3 + $0x148] sm:$0xff]  ;;  %v875_v36 = vsub.f32 %v2577_v0, %v874_v21 }
  0xda   :  { %v458_v22 = vand.u32 4294901760, %v457_v39  ;;  %v866_v59 = vand.u32 4294901760, %v2572_v18  ;;  %1236 = vmatpush.msra.mxu1 %v2288_v1  ;;  %1036 = vmatpush.msrb.mxu2 %v2286_v24  ;;  %v2613_v1 = vsub.f32 %v1801_v41, %v2581_v28  ;;  %v2633_v5 = vsub.f32 %v1800_v40, %v2602_v23 }
  0xdb   :  { %1104 = vmatpush.msrb.mxu3 %v2341_v20  ;;  %1179 = vmatpush.msra.mxu0 %v959_v35  ;;  %v2615_v35 = vand.u32 4294901760, %v1799_v15  ;;  %v1356_v2 = vand.u32 4294901760, %v2596_v30  ;;  %v2659_v52 = vsub.f32 %v351_v53, %v2623_v14  ;;  %v2672_v12 = vand.u32 4294901760, %v1797_v19 }
  0xdc   :  { %v867_v24 = vsub.f32 %v2572_v18, %v866_v59  ;;  %1238 = vmatpush.msra.mxu1 %v2312_v47  ;;  %1039 = vmatpush.msrb.mxu2 %v2307_v7  ;;  %v1798_v47 = vld [vmem:[%s3010_s3 + $0x150] sm:$0xff]  ;;  %v1368_v39 = vand.u32 4294901760, %v2633_v5 }
  0xdd   :  { %459 = vmatmul.f32.gmra.mxu2 %v458_v22  ;;  %816 = vmatmul.f32.vlgmr.msra.gmra.mxu3 %v2414_v8  ;;  %v2640_v50 = vand.u32 4294901760, %v1798_v47  ;;  %v1357_v41 = vsub.f32 %v2596_v30, %v1356_v2 }
  0xde   :  { %v868_v7 = vand.u32 4294901760, %v867_v24  ;;  %1106 = vmatpush.msrb.mxu3 %v2357_v4  ;;  %1183 = vmatpush.msra.mxu0 %v965_v60  ;;  %v2647_v60 = vsel %vm2617_vm7, 0.0, %v340_v10  ;;  %v1369_v40 = vsub.f32 %v2633_v5, %v1368_v39  ;;  %v2709_v10 = vsub.f32 %v1797_v19, %v2672_v12 }
  0xdf   :  { %1240 = vmatpush.msra.mxu1 %v2331_v34  ;;  %1042 = vmatpush.msrb.mxu2 %v2329_v37  ;;  %v1362_v34 = vand.u32 4294901760, %v2613_v1  ;;  %v2652_v37 = vsub.f32 %v1799_v15, %v2615_v35  ;;  %v2723_v15 = vsub.f32 %v1796_v32, %v2692_v25  ;;  %v1792_v32 = vld [vmem:[%s3010_s3 + $0x120] sm:$0xff] }
  0xe0   :  { %869 = vmatmul.f32.vlgmr.msrb.gmra.mxu0 %v868_v7  ;;  %1108 = vmatpush.msrb.mxu3 %v2382_v61  ;;  %v1370_v3 = vand.u32 4294901760, %v1369_v40 }
  0xe1   :  { %994 = vmatmul.f32.vlgmr.msrb.gmra.mxu1 %v2543_v54  ;;  %1187 = vmatpush.msra.mxu0 %v971_v16  ;;  %v328_v16 = vsel %vm327_vm4, %v325_v63, %v326_v45  ;;  %v1363_v9 = vsub.f32 %v2613_v1, %v1362_v34  ;;  %v1374_v38 = vand.u32 4294901760, %v2652_v37  ;;  %v876_v45 = vand.u32 4294901760, %v875_v36 }
  0xe2   :  { %1242 = vmatpush.msra.mxu1 %v2341_v20  ;;  %1045 = vmatpush.msrb.mxu2 %v2348_v29  ;;  %v1352_v20 = vand.u32 4294901760, %v1351_v33  ;;  %v2684_v29 = vsub.f32 %v1798_v47, %v2640_v50  ;;  %v1358_v63 = vand.u32 4294901760, %v1357_v41  ;;  %v3021_v47 = vand.u32 4294901760, %v2709_v10 }
  0xe3   :  { %1110 = vmatpush.msrb.mxu3 %v2398_v58  ;;  %1191 = vmatpush.msra.mxu0 %v977_v44  ;;  %v1795_v44 = vld [vmem:[%s3010_s3 + $0x138] sm:$0xff]  ;;  %v1375_v53 = vsub.f32 %v2652_v37, %v1374_v38  ;;  %v3020_v19 = vand.u32 4294901760, %v2723_v15 }
  0xe4   :  { %1244 = vmatpush.msra.mxu1 %v2357_v4  ;;  %1048 = vmatpush.msrb.mxu2 %v2355_v56  ;;  %v882_v4 = vand.u32 4294901760, %v2659_v52  ;;  %v2700_v56 = vand.u32 4294901760, %v328_v16  ;;  %v2713_v22 = vand.u32 4294901760, %v1795_v44 }
  0xe5   :  { %767 = vmatmul.f32.vlgmr.msra.gmra.mxu2 %v2414_v8  ;;  %820 = vmatmul.f32.gmra.mxu3 %v2445_v55  ;;  %v1380_v8 = vand.u32 4294901760, %v2684_v29 }
  0xe6   :  { %1195 = vmatpush.msra.mxu0 %v983_v57  ;;  %1246 = vmatpush.msra.mxu1 %v2382_v61  ;;  %v1794_v57 = vld [vmem:[%s3010_s3 + $0x130] sm:$0xff]  ;;  %v1364_v61 = vand.u32 4294901760, %v1363_v9  ;;  %v2735_v24 = vsub.f32 %v328_v16, %v2700_v56  ;;  %v2747_v33 = vsub.f32 %v1795_v44, %v2713_v22  ;;  %v2769_v44 = vand.u32 4294901760, %v1792_v32 }
  0xe7   :  { %1353 = vmatpush.msra.mxu3 %v1352_v20  ;;  %1051 = vmatpush.msrb.mxu2 %v2372_v31  ;;  %v883_v31 = vsub.f32 %v2659_v52, %v882_v4  ;;  %v2739_v7 = vand.u32 4294901760, %v1794_v57 }
  0xe8   :  { %877 = vmatmul.f32.gmra.mxu0 %v876_v45  ;;  %1248 = vmatpush.msra.mxu1 %v2398_v58  ;;  %v1793_v58 = vld [vmem:[%s3010_s3 + $0x128] sm:$0xff]  ;;  %v890_v16 = vand.u32 4294901760, %v2735_v24  ;;  %v3019_v9 = vand.u32 4294901760, %v2747_v33  ;;  %v1791_v45 = vld [vmem:[%s3010_s3 + $0x118] sm:$0xff] }
  0xe9   :  { %998 = vmatmul.f32.gmra.mxu1 %v2538_v27  ;;  %1199 = vmatpush.msra.mxu0 %v989_v13  ;;  %v1381_v13 = vsub.f32 %v2684_v29, %v1380_v8  ;;  %v2751_v36 = vand.u32 4294901760, %v1793_v58  ;;  %v884_v41 = vand.u32 4294901760, %v883_v31  ;;  %v2764_v20 = vsub.f32 %v1794_v57, %v2739_v7  ;;  %v1790_v57 = vld [vmem:[%s3010_s3 + $0x110] sm:$0xff] }
  0xea   :  { %1359 = vmatpush.msra.mxu3 %v1358_v63  ;;  %1054 = vmatpush.msrb.mxu2 %v2396_v43  ;;  %v1376_v43 = vand.u32 4294901760, %v1375_v53  ;;  %v1393_v63 = vsub.f32 %v2723_v15, %v3020_v19 }
  0xeb   :  { %1463 = vmatpush.msrb.mxu0 %v2560_v6  ;;  %1531 = vmatpush.msrb.mxu1 %v2532_v51  ;;  %v2778_v40 = vsub.f32 %v1793_v58, %v2751_v36  ;;  %v3022_v31 = vand.u32 4294901760, %v2764_v20  ;;  %v2791_v58 = vand.u32 4294901760, %v1791_v45 }
  0xec   :  { %1365 = vmatpush.msra.mxu3 %v1364_v61  ;;  %1057 = vmatpush.msrb.mxu2 %v2411_v49  ;;  %v1387_v49 = vsub.f32 %v2709_v10, %v3021_v47  ;;  %v891_v61 = vsub.f32 %v2735_v24, %v890_v16 }
  0xed   :  { %771 = vmatmul.f32.gmra.mxu2 %v2445_v55  ;;  %824 = vmatmul.f32.gmra.mxu3 %v2471_v48  ;;  %v1382_v55 = vand.u32 4294901760, %v1381_v13  ;;  %v2798_v13 = vsub.f32 %v1792_v32, %v2769_v44  ;;  %v1405_v32 = vsub.f32 %v2764_v20, %v3022_v31 }
  0xee   :  { %1371 = vmatpush.msra.mxu3 %v1370_v3  ;;  %1466 = vmatpush.msrb.mxu0 %v2596_v30  ;;  %v1388_v53 = vand.u32 4294901760, %v1387_v49  ;;  %v1399_v3 = vsub.f32 %v2747_v33, %v3019_v9  ;;  %v2803_v49 = vand.u32 4294901760, %v1790_v57  ;;  %v892_v9 = vand.u32 4294901760, %v891_v61  ;;  %v1788_v61 = vld [vmem:[%s3010_s3 + $0x100] sm:$0xff] }
  0xef   :  { %1533 = vmatpush.msrb.mxu1 %v2548_v46  ;;  %1284 = vmatpush.msra.mxu2 %v2532_v51 }
  0xf0   :  { %885 = vmatmul.f32.gmra.mxu0 %v884_v41  ;;  %1377 = vmatpush.msra.mxu3 %v1376_v43  ;;  %v1394_v43 = vand.u32 4294901760, %v1393_v63  ;;  %v3023_v41 = vand.u32 4294901760, %v2778_v40  ;;  %v2815_v63 = vsub.f32 %v1791_v45, %v2791_v58  ;;  %v1400_v19 = vand.u32 4294901760, %v1399_v3 }
  0xf1   :  { %1002 = vmatmul.f32.gmra.mxu1 %v2623_v14  ;;  %1469 = vmatpush.msrb.mxu0 %v2613_v1  ;;  %v1406_v3 = vand.u32 4294901760, %v1405_v32 }
  0xf2   :  { %1535 = vmatpush.msrb.mxu1 %v2581_v28  ;;  %1286 = vmatpush.msra.mxu2 %v2548_v46  ;;  %v1411_v45 = vsub.f32 %v2778_v40, %v3023_v41  ;;  %v1422_v31 = vand.u32 4294901760, %v2815_v63 }
  0xf3   :  { %1383 = vmatpush.msra.mxu3 %v1382_v55  ;;  %1472 = vmatpush.msrb.mxu0 %v2633_v5  ;;  %v1789_v55 = vld [vmem:[%s3010_s3 + $0x108] sm:$0xff]  ;;  %v1339_v5 = vand.u32 4294901760, %v2647_v60 }
  0xf4   :  { %1537 = vmatpush.msrb.mxu1 %v2602_v23  ;;  %1288 = vmatpush.msra.mxu2 %v2581_v28  ;;  %v2820_v47 = vand.u32 4294901760, %v1789_v55  ;;  %v1412_v41 = vand.u32 4294901760, %v1411_v45 }
  0xf5   :  { %775 = vmatmul.f32.gmra.mxu2 %v2471_v48  ;;  %828 = vmatmul.f32.gmra.mxu3 %v2510_v11  ;;  %v1416_v48 = vand.u32 4294901760, %v2798_v13 }
  0xf6   :  { %1389 = vmatpush.msra.mxu3 %v1388_v53  ;;  %1475 = vmatpush.msrb.mxu0 %v2652_v37  ;;  %v2829_v53 = vsub.f32 %v1790_v57, %v2803_v49  ;;  %v1340_v37 = vsub.f32 %v2647_v60, %v1339_v5 }
  0xf7   :  { %1539 = vmatpush.msrb.mxu1 %v2615_v35  ;;  %1290 = vmatpush.msra.mxu2 %v2602_v23  ;;  %v1417_v57 = vsub.f32 %v2798_v13, %v1416_v48 }
  0xf8   :  { %893 = vmatmul.f32.gmra.mxu0 %v892_v9  ;;  %1395 = vmatpush.msra.mxu3 %v1394_v43  ;;  %v2836_v9 = vand.u32 4294901760, %v1788_v61  ;;  %v2843_v43 = vsub.f32 %v1789_v55, %v2820_v47  ;;  %v1428_v32 = vand.u32 4294901760, %v2829_v53 }
  0xf9   :  { %1006 = vmatmul.f32.gmra.mxu1 %v2700_v56  ;;  %1478 = vmatpush.msrb.mxu0 %v2684_v29  ;;  %v1418_v45 = vand.u32 4294901760, %v1417_v57 }
  0xfa   :  { %1541 = vmatpush.msrb.mxu1 %v2640_v50  ;;  %1292 = vmatpush.msra.mxu2 %v2615_v35  ;;  %v2856_v55 = vsub.f32 %v1788_v61, %v2836_v9 }
  0xfb   :  { %1401 = vmatpush.msra.mxu3 %v1400_v19  ;;  %1481 = vmatpush.msrb.mxu0 %v2709_v10  ;;  %v1423_v19 = vsub.f32 %v2815_v63, %v1422_v31 }
  0xfc   :  { %1543 = vmatpush.msrb.mxu1 %v2672_v12  ;;  %1294 = vmatpush.msra.mxu2 %v2640_v50 }
  0xfd   :  { %779 = vmatmul.f32.gmra.mxu2 %v2510_v11  ;;  %1114 = vmatmul.f32.vlgmr.msrb.gmra.mxu3 %v866_v59  ;;  %v1434_v11 = vand.u32 4294901760, %v2843_v43  ;;  %v1429_v59 = vsub.f32 %v2829_v53, %v1428_v32  ;;  %v1424_v61 = vand.u32 4294901760, %v1423_v19 }
  0xfe   :  { %1407 = vmatpush.msra.mxu3 %v1406_v3  ;;  %1484 = vmatpush.msrb.mxu0 %v2723_v15  ;;  %v1440_v3 = vand.u32 4294901760, %v2856_v55 }
  0xff   :  { %1545 = vmatpush.msrb.mxu1 %v2692_v25  ;;  %1296 = vmatpush.msra.mxu2 %v2672_v12 }
 0x100   :  { %1201 = vmatmul.f32.vlgmr.msra.gmra.mxu0 %v2543_v54  ;;  %1413 = vmatpush.msra.mxu3 %v1412_v41  ;;  %v1435_v41 = vsub.f32 %v2843_v43, %v1434_v11  ;;  %v1441_v57 = vsub.f32 %v2856_v55, %v1440_v3 }
 0x101   :  { %1250 = vmatmul.f32.vlgmr.msra.gmra.mxu1 %v2543_v54  ;;  %1487 = vmatpush.msrb.mxu0 %v2747_v33  ;;  %v1430_v54 = vand.u32 4294901760, %v1429_v59 }
 0x102   :  { %1547 = vmatpush.msrb.mxu1 %v2713_v22  ;;  %1298 = vmatpush.msra.mxu2 %v2692_v25  ;;  %v1436_v19 = vand.u32 4294901760, %v1435_v41 }
 0x103   :  { %1419 = vmatpush.msra.mxu3 %v1418_v45  ;;  %1490 = vmatpush.msrb.mxu0 %v2764_v20 }
 0x104   :  { %1549 = vmatpush.msrb.mxu1 %v2739_v7  ;;  %1300 = vmatpush.msra.mxu2 %v2713_v22 }
 0x105   :  { %1060 = vmatmul.f32.vlgmr.msrb.gmra.mxu2 %v2572_v18  ;;  %1120 = vmatmul.f32.gmra.mxu3 %v874_v21  ;;  %v1442_v18 = vand.u32 4294901760, %v1441_v57  ;;  %v3038_v21 = vand.u32 4294901760, %v2747_v33 }
 0x106   :  { %1425 = vmatpush.msra.mxu3 %v1424_v61  ;;  %1493 = vmatpush.msrb.mxu0 %v2778_v40 }
 0x107   :  { %1551 = vmatpush.msrb.mxu1 %v2751_v36  ;;  %1302 = vmatpush.msra.mxu2 %v2739_v7 }
 0x108   :  { %1205 = vmatmul.f32.gmra.mxu0 %v2538_v27  ;;  %1431 = vmatpush.msra.mxu3 %v1430_v54 }
 0x109   :  { %1254 = vmatmul.f32.gmra.mxu1 %v2538_v27  ;;  %1496 = vmatpush.msrb.mxu0 %v2798_v13  ;;  %v2906_v27 = vand.u32 4294901760, %v2453_v62 }
 0x10a   :  { %1553 = vmatpush.msrb.mxu1 %v2769_v44  ;;  %1304 = vmatpush.msra.mxu2 %v2751_v36 }
 0x10b   :  { %1437 = vmatpush.msra.mxu3 %v1436_v19  ;;  %1499 = vmatpush.msrb.mxu0 %v2815_v63 }
 0x10c   :  { %1555 = vmatpush.msrb.mxu1 %v2791_v58  ;;  %1306 = vmatpush.msra.mxu2 %v2769_v44 }
 0x10d   :  { %1065 = vmatmul.f32.gmra.mxu2 %v2577_v0  ;;  %1126 = vmatmul.f32.gmra.mxu3 %v882_v4  ;;  %v2928_v0 = vand.u32 4294901760, %v2488_v17 }
 0x10e   :  { %1443 = vmatpush.msra.mxu3 %v1442_v18  ;;  %1502 = vmatpush.msrb.mxu0 %v2829_v53 }
 0x10f   :  { %1557 = vmatpush.msrb.mxu1 %v2803_v49  ;;  %1308 = vmatpush.msra.mxu2 %v2791_v58  ;;  %v1324_v6 = vsub.f32 %v2488_v17, %v2928_v0  ;;  %v3036_v17 = vand.u32 4294901760, %v2709_v10 }
 0x110   :  { %1209 = vmatmul.f32.gmra.mxu0 %v2623_v14  ;;  %1669 = vmatpush.msrb.mxu3 %v2532_v51  ;;  %v1316_v51 = vsub.f32 %v2453_v62, %v2906_v27 }
 0x111   :  { %1258 = vmatmul.f32.gmra.mxu1 %v2623_v14  ;;  %1505 = vmatpush.msrb.mxu0 %v2843_v43  ;;  %v1325_v30 = vand.u32 4294901760, %v1324_v6 }
 0x112   :  { %1559 = vmatpush.msrb.mxu1 %v2820_v47  ;;  %1310 = vmatpush.msra.mxu2 %v2803_v49 }
 0x113   :  { %1508 = vmatpush.msrb.mxu0 %v2856_v55  ;;  %1671 = vmatpush.msrb.mxu3 %v2548_v46  ;;  %v1317_v46 = vand.u32 4294901760, %v1316_v51 }
 0x114   :  { %1561 = vmatpush.msrb.mxu1 %v2836_v9  ;;  %1312 = vmatpush.msra.mxu2 %v2820_v47 }
 0x115   :  { %1070 = vmatmul.f32.gmra.mxu2 %v2659_v52  ;;  %1132 = vmatmul.f32.gmra.mxu3 %v890_v16  ;;  %v1318_v62 = vsub.f32 %v1316_v51, %v1317_v46 }
 0x116   :  { %1673 = vmatpush.msrb.mxu3 %v2581_v28  ;;  %1314 = vmatpush.msra.mxu2 %v2836_v9 }
 0x117   :  { %v1319_v28 = vand.u32 4294901760, %v1318_v62 }
 0x118   :  { %1590 = vmatpush.msrb.mxu2 %v1350_v26  ;;  %1213 = vmatmul.f32.gmra.mxu0 %v2700_v56  ;;  %v1331_v26 = vand.u32 4294901760, %v2569_v42 }
 0x119   :  { %1675 = vmatpush.msrb.mxu3 %v2602_v23  ;;  %1262 = vmatmul.f32.gmra.mxu1 %v2700_v56  ;;  %v1326_v23 = vsub.f32 %v1324_v6, %v1325_v30 }
 0x11a   :  { %1594 = vmatpush.msrb.mxu2 %v1356_v2  ;;  %v1332_v1 = vsub.f32 %v2569_v42, %v1331_v26  ;;  %v3040_v42 = vand.u32 4294901760, %v2778_v40 }
 0x11b   :  { %1677 = vmatpush.msrb.mxu3 %v2615_v35  ;;  %v3037_v35 = vand.u32 4294901760, %v2723_v15  ;;  %v1327_v14 = vand.u32 4294901760, %v1326_v23 }
 0x11c   :  { %1598 = vmatpush.msrb.mxu2 %v1362_v34  ;;  %v1333_v2 = vand.u32 4294901760, %v1332_v1 }
 0x11d   :  { %1679 = vmatpush.msrb.mxu3 %v2640_v50  ;;  %1075 = vmatmul.f32.gmra.mxu2 %v2735_v24  ;;  %v3039_v50 = vand.u32 4294901760, %v2764_v20 }
 0x11e   :  { %1445 = vmatmul.f32.vlgmr.msra.gmra.mxu3 %v2906_v27  ;;  %1602 = vmatpush.msrb.mxu2 %v1368_v39  ;;  %v1334_v34 = vsub.f32 %v1332_v1, %v1333_v2  ;;  %v1341_v39 = vand.u32 4294901760, %v1340_v37 }
 0x11f   :  { %1681 = vmatpush.msrb.mxu3 %v2672_v12 }
 0x120   :  { %1511 = vmatmul.f32.vlgmr.msrb.gmra.mxu0 %v1316_v51  ;;  %1606 = vmatpush.msrb.mxu2 %v1374_v38  ;;  %v1335_v52 = vand.u32 4294901760, %v1334_v34  ;;  %v1342_v60 = vsub.f32 %v1340_v37, %v1341_v39 }
 0x121   :  { %1683 = vmatpush.msrb.mxu3 %v2692_v25  ;;  %1565 = vmatmul.f32.vlgmr.msrb.gmra.mxu1 %v1317_v46 }
 0x122   :  { %1610 = vmatpush.msrb.mxu2 %v1380_v8  ;;  %v1343_v12 = vand.u32 4294901760, %v1342_v60 }
 0x123   :  { %1685 = vmatpush.msrb.mxu3 %v2713_v22 }
 0x124   :  { %1614 = vmatpush.msrb.mxu2 %v3036_v17 }
 0x125   :  { %1687 = vmatpush.msrb.mxu3 %v2739_v7  ;;  %1320 = vmatmul.f32.vlgmr.msra.gmra.mxu2 %v1319_v28 }
 0x126   :  { %1449 = vmatmul.f32.gmra.mxu3 %v2928_v0  ;;  %1618 = vmatpush.msrb.mxu2 %v3037_v35 }
 0x127   :  { %1689 = vmatpush.msrb.mxu3 %v2751_v36 }
 0x128   :  { %1516 = vmatmul.f32.gmra.mxu0 %v1324_v6  ;;  %1622 = vmatpush.msrb.mxu2 %v3038_v21 }
 0x129   :  { %1571 = vmatmul.f32.gmra.mxu1 %v1325_v30  ;;  %1691 = vmatpush.msrb.mxu3 %v2769_v44 }
 0x12a   :  { %1626 = vmatpush.msrb.mxu2 %v3039_v50 }
 0x12b   :  { %1693 = vmatpush.msrb.mxu3 %v2791_v58 }
 0x12c   :  { %1630 = vmatpush.msrb.mxu2 %v3040_v42 }
 0x12d   :  { %1328 = vmatmul.f32.gmra.mxu2 %v1327_v14  ;;  %1695 = vmatpush.msrb.mxu3 %v2803_v49 }
 0x12e   :  { %1453 = vmatmul.f32.gmra.mxu3 %v1331_v26  ;;  %1634 = vmatpush.msrb.mxu2 %v1416_v48 }
 0x12f   :  { %1697 = vmatpush.msrb.mxu3 %v2820_v47 }
 0x130   :  { %1521 = vmatmul.f32.gmra.mxu0 %v1332_v1  ;;  %1638 = vmatpush.msrb.mxu2 %v1422_v31 }
 0x131   :  { %1577 = vmatmul.f32.gmra.mxu1 %v1333_v2  ;;  %1699 = vmatpush.msrb.mxu3 %v2836_v9 }
 0x132   :  { %1642 = vmatpush.msrb.mxu2 %v1428_v32 }
 0x134   :  { %1646 = vmatpush.msrb.mxu2 %v1434_v11 }
 0x135   :  { %1336 = vmatmul.f32.gmra.mxu2 %v1335_v52 }
 0x136   :  { %1457 = vmatmul.f32.gmra.mxu3 %v1339_v5  ;;  %1650 = vmatpush.msrb.mxu2 %v1440_v3 }
 0x138   :  { %1526 = vmatmul.f32.gmra.mxu0 %v1340_v37 }
 0x139   :  { %1583 = vmatmul.f32.gmra.mxu1 %v1341_v39 }
 0x13b   :  { %v627_v38 = vpop.f32.mrf.mxu0 }
 0x13d   :  { %1344 = vmatmul.f32.gmra.mxu2 %v1343_v12  ;;  %v681_v25 = vpop.f32.mrf.mxu1 }
 0x13e   :  { %1701 = vmatmul.f32.vlgmr.msrb.gmra.mxu3 %v2906_v27 }
 0x13f   :  { %v561_v29 = vpop.f32.mrf.mxu3 }
 0x144   :  { %v632_v15 = vpop.f32.mrf.mxu0 }
 0x145   :  { %1652 = vmatmul.f32.vlgmr.msrb.gmra.mxu2 %v2906_v27 }
 0x146   :  { %1705 = vmatmul.f32.gmra.mxu3 %v2928_v0  ;;  %v687_v24 = vpop.f32.mrf.mxu1 }
 0x147   :  { %v436_v4 = vpop.f32.mrf.mxu2  ;;  %v565_v10 = vpop.f32.mrf.mxu3 }
 0x148   :  { %v562_v56 = vadd.f32 %v561_v29, %v436_v4 }
 0x14a   :  { %v628_v8 = vadd.f32 %v627_v38, %v562_v56 }
 0x14c   :  { %v682_v22 = vadd.f32 %v681_v25, %v628_v8  ;;  %v637_v20 = vpop.f32.mrf.mxu0 }
 0x14d   :  { %1656 = vmatmul.f32.gmra.mxu2 %v2928_v0 }
 0x14e   :  { %1709 = vmatmul.f32.gmra.mxu3 %v1331_v26  ;;  %v693_v58 = vpop.f32.mrf.mxu1 }
 0x150   :  { %v444_v47 = vpop.f32.mrf.mxu2  ;;  %v569_v7 = vpop.f32.mrf.mxu3 }
 0x151   :  { %v566_v33 = vadd.f32 %v565_v10, %v444_v47 }
 0x153   :  { %v633_v36 = vadd.f32 %v632_v15, %v566_v33 }
 0x154   :  { %v642_v9 = vpop.f32.mrf.mxu0 }
 0x155   :  { %1660 = vmatmul.f32.gmra.mxu2 %v1331_v26  ;;  %v688_v16 = vadd.f32 %v687_v24, %v633_v36 }
 0x156   :  { %1713 = vmatmul.f32.gmra.mxu3 %v1339_v5  ;;  %v699_v32 = vpop.f32.mrf.mxu1 }
 0x158   :  { %v452_v44 = vpop.f32.mrf.mxu2  ;;  %v573_v40 = vpop.f32.mrf.mxu3 }
 0x159   :  { %v570_v31 = vadd.f32 %v569_v7, %v452_v44 }
 0x15b   :  { %v638_v13 = vadd.f32 %v637_v20, %v570_v31 }
 0x15d   :  { %1664 = vmatmul.f32.gmra.mxu2 %v1339_v5  ;;  %v694_v49 = vadd.f32 %v693_v58, %v638_v13  ;;  %v870_v61 = vpop.f32.mrf.mxu0 }
 0x15e   :  { %v995_v41 = vpop.f32.mrf.mxu1 }
 0x160   :  { %v460_v63 = vpop.f32.mrf.mxu2  ;;  %v817_v48 = vpop.f32.mrf.mxu3 }
 0x161   :  { %v574_v53 = vadd.f32 %v573_v40, %v460_v63 }
 0x163   :  { %v643_v43 = vadd.f32 %v642_v9, %v574_v53 }
 0x165   :  { %v700_v55 = vadd.f32 %v699_v32, %v643_v43  ;;  %v878_v27 = vpop.f32.mrf.mxu0 }
 0x166   :  { %v999_v0 = vpop.f32.mrf.mxu1 }
 0x168   :  { %v768_v45 = vpop.f32.mrf.mxu2  ;;  %v821_v11 = vpop.f32.mrf.mxu3 }
 0x169   :  { %v769_v59 = vadd.f32 %v768_v45, %v682_v22 }
 0x16b   :  { %v818_v3 = vadd.f32 %v817_v48, %v769_v59 }
 0x16d   :  { %v886_v28 = vpop.f32.mrf.mxu0  ;;  %v871_v47 = vadd.f32 %v870_v61, %v818_v3 }
 0x16e   :  { %v1003_v23 = vpop.f32.mrf.mxu1 }
 0x16f   :  { %v996_v36 = vadd.f32 %v995_v41, %v871_v47 }
 0x170   :  { %v772_v54 = vpop.f32.mrf.mxu2  ;;  %v825_v57 = vpop.f32.mrf.mxu3 }
 0x171   :  { %v773_v19 = vadd.f32 %v772_v54, %v688_v16 }
 0x173   :  { %v822_v18 = vadd.f32 %v821_v11, %v773_v19 }
 0x175   :  { %v894_v14 = vpop.f32.mrf.mxu0  ;;  %v879_v31 = vadd.f32 %v878_v27, %v822_v18 }
 0x176   :  { %v2982_v2 = vpop.f32.mrf.mxu1 }
 0x177   :  { %v1000_v63 = vadd.f32 %v999_v0, %v879_v31 }
 0x178   :  { %v776_v51 = vpop.f32.mrf.mxu2  ;;  %v829_v46 = vpop.f32.mrf.mxu3 }
 0x179   :  { %v777_v62 = vadd.f32 %v776_v51, %v694_v49 }
 0x17b   :  { %v826_v6 = vadd.f32 %v825_v57, %v777_v62  ;;  %v1808_v57 = vld [vmem:[%s3011_s4] ss:$0 sm:$0xff]  ;;  %s1835_s4 = smov [#allocation2]  }
 0x17c   :  { %s1758_s16 = sshll.u32 %s1835_s4, 4  ;;  %s1759_s16 = int_to_ptr.vmem [resolvable:$true] %s1758_s16 }
 0x17d   :  { %v1202_v42 = vpop.f32.mrf.mxu0 }
 0x17e   :  { %v1251_v34 = vpop.f32.mrf.mxu1 }
 0x180   :  { %v780_v30 = vpop.f32.mrf.mxu2  ;;  %v1115_v26 = vpop.f32.mrf.mxu3 }
 0x181   :  { %v781_v17 = vadd.f32 %v780_v30, %v700_v55  ;;  %v887_v55 = vadd.f32 %v886_v28, %v826_v6 }
 0x183   :  { %v830_v1 = vadd.f32 %v829_v46, %v781_v17  ;;  %v1004_v19 = vadd.f32 %v1003_v23, %v887_v55 }
 0x185   :  { %v1206_v39 = vpop.f32.mrf.mxu0  ;;  %v895_v6 = vadd.f32 %v894_v14, %v830_v1 }
 0x186   :  { %v1255_v29 = vpop.f32.mrf.mxu1 }
 0x188   :  { %v1061_v35 = vpop.f32.mrf.mxu2  ;;  %v1121_v21 = vpop.f32.mrf.mxu3 }
 0x189   :  { %v1062_v16 = vadd.f32 %v1061_v35, %v996_v36 }
 0x18b   :  { %v1116_v58 = vadd.f32 %v1115_v26, %v1062_v16 }
 0x18d   :  { %v1210_v38 = vpop.f32.mrf.mxu0  ;;  %v1203_v53 = vadd.f32 %v1202_v42, %v1116_v58 }
 0x18e   :  { %v2986_v56 = vpop.f32.mrf.mxu1 }
 0x18f   :  { %v1252_v41 = vadd.f32 %v1251_v34, %v1203_v53 }
 0x190   :  { %v1066_v5 = vpop.f32.mrf.mxu2  ;;  %v1127_v50 = vpop.f32.mrf.mxu3 }
 0x191   :  { %v1067_v9 = vadd.f32 %v1066_v5, %v1000_v63 }
 0x193   :  { %v1122_v61 = vadd.f32 %v1121_v21, %v1067_v9 }
 0x195   :  { %v2988_v22 = vpop.f32.mrf.mxu0  ;;  %v1207_v46 = vadd.f32 %v1206_v39, %v1122_v61 }
 0x196   :  { %v2990_v15 = vpop.f32.mrf.mxu1 }
 0x197   :  { %v1256_v34 = vadd.f32 %v1255_v29, %v1207_v46 }
 0x198   :  { %v1071_v37 = vpop.f32.mrf.mxu2  ;;  %v2984_v52 = vpop.f32.mrf.mxu3 }
 0x199   :  { %v1072_v27 = vadd.f32 %v1071_v37, %v1004_v19 }
 0x19b   :  { %v1128_v21 = vadd.f32 %v1127_v50, %v1072_v27 }
 0x19d   :  { %v1512_v33 = vpop.f32.mrf.mxu0 }
 0x19e   :  { %v1566_v44 = vpop.f32.mrf.mxu1 }
 0x1a0   :  { %v1076_v60 = vpop.f32.mrf.mxu2 }
 0x1a1   :  { %v1446_v12 = vpop.f32.mrf.mxu3 }
 0x1a5   :  { %v1517_v48 = vpop.f32.mrf.mxu0 }
 0x1a6   :  { %v1572_v59 = vpop.f32.mrf.mxu1 }
 0x1a8   :  { %v1321_v25 = vpop.f32.mrf.mxu2 }
 0x1a9   :  { %v1450_v4 = vpop.f32.mrf.mxu3  ;;  %v1447_v20 = vadd.f32 %v1446_v12, %v1321_v25  ;;  %v1008_v25 = vadd.f32 %v2982_v2, %v895_v6 }
 0x1ab   :  { %v1513_v13 = vadd.f32 %v1512_v33, %v1447_v20  ;;  %v1077_v39 = vadd.f32 %v1076_v60, %v1008_v25 }
 0x1ad   :  { %v1567_v32 = vadd.f32 %v1566_v44, %v1513_v13  ;;  %v1522_v28 = vpop.f32.mrf.mxu0  ;;  %v1134_v2 = vadd.f32 %v2984_v52, %v1077_v39 }
 0x1ae   :  { %v1578_v23 = vpop.f32.mrf.mxu1 }
 0x1af   :  { %v1215_v58 = vadd.f32 %v2988_v22, %v1134_v2 }
 0x1b0   :  { %v1329_v10 = vpop.f32.mrf.mxu2 }
 0x1b1   :  { %v1454_v8 = vpop.f32.mrf.mxu3  ;;  %v1451_v43 = vadd.f32 %v1450_v4, %v1329_v10  ;;  %v1211_v10 = vadd.f32 %v1210_v38, %v1128_v21 }
 0x1b3   :  { %v1518_v3 = vadd.f32 %v1517_v48, %v1451_v43  ;;  %v1260_v29 = vadd.f32 %v2986_v56, %v1211_v10 }
 0x1b5   :  { %v1573_v30 = vadd.f32 %v1572_v59, %v1518_v3  ;;  %v1527_v20 = vpop.f32.mrf.mxu0 }
 0x1b6   :  { %v1584_v31 = vpop.f32.mrf.mxu1 }
 0x1b8   :  { %v1337_v24 = vpop.f32.mrf.mxu2 }
 0x1b9   :  { %v1458_v7 = vpop.f32.mrf.mxu3  ;;  %v1455_v0 = vadd.f32 %v1454_v8, %v1337_v24 }
 0x1bb   :  { %v1523_v5 = vadd.f32 %v1522_v28, %v1455_v0 }
 0x1bd   :  { %v1579_v1 = vadd.f32 %v1578_v23, %v1523_v5 }
 0x1c0   :  { %v1345_v40 = vpop.f32.mrf.mxu2 }
 0x1c1   :  { %v1702_v49 = vpop.f32.mrf.mxu3  ;;  %v1459_v8 = vadd.f32 %v1458_v7, %v1345_v40 }
 0x1c3   :  { %v1528_v44 = vadd.f32 %v1527_v20, %v1459_v8 }
 0x1c5   :  { %v1585_v63 = vadd.f32 %v1584_v31, %v1528_v44 }
 0x1c8   :  { %v1653_v45 = vpop.f32.mrf.mxu2 }
 0x1c9   :  { %v1654_v11 = vadd.f32 %v1653_v45, %v1567_v32  ;;  %v1706_v51 = vpop.f32.mrf.mxu3  ;;  %v1264_v32 = vadd.f32 %v2990_v15, %v1215_v58 }
 0x1cb   :  { %v1703_v54 = vadd.f32 %v1702_v49, %v1654_v11 }
 0x1cd   :  { %v1717_v18 = vadd.f32 %v1703_v54, %v1252_v41 }
 0x1cf   :  { %v1725_v62 = vadd.f32 %v1808_v57, %v1717_v18 }
 0x1d0   :  { %v1657_v26 = vpop.f32.mrf.mxu2 }
 0x1d1   :  { %v1729_v17 = vadd.f32 3.0, %v1725_v62  ;;  %v1658_v35 = vadd.f32 %v1657_v26, %v1573_v30  ;;  %v1710_v14 = vpop.f32.mrf.mxu3 }
 0x1d3   :  { %v1733_v42 = vmax.f32 %v1729_v17, 0.0  ;;  %v1707_v12 = vadd.f32 %v1706_v51, %v1658_v35 }
 0x1d5   :  { %v1737_v4 = vmin.f32 %v1733_v42, 6.0  ;;  %v1718_v37 = vadd.f32 %v1707_v12, %v1256_v34 }
 0x1d7   :  { %v1741_v24 = vmul.f32 0.16666667, %v1737_v4  ;;  %v1726_v47 = vadd.f32 %v1808_v57, %v1718_v37 }
 0x1d8   :  { %v1661_v33 = vpop.f32.mrf.mxu2 }
 0x1d9   :  { %v1745_v36 = vmul.f32 %v1741_v24, %v1725_v62  ;;  %v1730_v50 = vadd.f32 3.0, %v1726_v47  ;;  %v1662_v16 = vadd.f32 %v1661_v33, %v1579_v1  ;;  %v1714_v56 = vpop.f32.mrf.mxu3 }
 0x1db   :  { %1750 = vst.msk [vmem:[#allocation2] sm:$0xff] %vm1749_vm8, %v1745_v36  ;;  %v1734_v38 = vmax.f32 %v1730_v50, 0.0  ;;  %v1711_v60 = vadd.f32 %v1710_v14, %v1662_v16 }
 0x1dd   :  { %v1738_v7 = vmin.f32 %v1734_v38, 6.0  ;;  %v1719_v40 = vadd.f32 %v1711_v60, %v1260_v29 }
 0x1df   :  { %v1742_v13 = vmul.f32 0.16666667, %v1738_v7  ;;  %v1727_v49 = vadd.f32 %v1808_v57, %v1719_v40 }
 0x1e0   :  { %v1665_v48 = vpop.f32.mrf.mxu2 }
 0x1e1   :  { %v1746_v53 = vmul.f32 %v1742_v13, %v1726_v47  ;;  %v1731_v9 = vadd.f32 3.0, %v1727_v49  ;;  %v1666_v43 = vadd.f32 %v1665_v48, %v1585_v63 }
 0x1e3   :  { %1751 = vst.msk [vmem:[#allocation2 + $0x8] sm:$0xff] %vm1749_vm8, %v1746_v53  ;;  %v1735_v52 = vmax.f32 %v1731_v9, 0.0  ;;  %v1715_v55 = vadd.f32 %v1714_v56, %v1666_v43 }
 0x1e5   :  { %v1739_v45 = vmin.f32 %v1735_v52, 6.0  ;;  %v1720_v11 = vadd.f32 %v1715_v55, %v1264_v32 }
 0x1e7   :  { %v1743_v59 = vmul.f32 0.16666667, %v1739_v45  ;;  %v1728_v61 = vadd.f32 %v1808_v57, %v1720_v11 }
 0x1e9   :  { %v1747_v3 = vmul.f32 %v1743_v59, %v1727_v49  ;;  %v1732_v22 = vadd.f32 3.0, %v1728_v61 }
 0x1eb   :  { %1752 = vst.msk [vmem:[#allocation2 + $0x10] sm:$0xff] %vm1749_vm8, %v1747_v3  ;;  %v1736_v41 = vmax.f32 %v1732_v22, 0.0 }
 0x1ed   :  { %v1740_v54 = vmin.f32 %v1736_v41, 6.0 }
 0x1ef   :  { %v1744_v19 = vmul.f32 0.16666667, %v1740_v54 }
 0x1f1   :  { %v1748_v15 = vmul.f32 %v1744_v19, %v1728_v61 }
 0x1f3   :  { %1753 = vst.msk [vmem:[#allocation2 + $0x18] sm:$0xff] %vm1749_vm8, %v1748_v15 }
 0x1f4   :  { %1766 = dma.vmem_to_hbm [thread:$0]  %s1759_s16, 512, %s1761_s19, [#allocation3], %s1836_s20, %s1836_s20, %s1837_s21  }
 0x1f5   :  { %1833 = dma.done.wait [#allocation3], 512  }
 0x1f6   :  { %1834 = vsyncadd [#allocation3], 4294966784 }
 0x1f7   :  { %1771 = vsyncpa [#allocation3], 1 }

</bundles_post_ra>
